<compile_context>
chip_gen: v7x
topology: tpu7x:2x2x1
jax: 0.10.0
libtpu: 0.0.40
codegen_flags: <defaults>
</compile_context>

<pallas_src>
import functools

import jax
import jax.numpy as jnp
from jax.experimental import pallas as pl
from jax.experimental.pallas import tpu as pltpu

EPS = 1e-5


def _round_up(x, m):
    return (x + m - 1) // m * m


# ----------------------------------------------------------------------------
# Pallas kernel: one grid step per batch element.
#   x_ref  : (1, C, Lin)  zero-padded image, flattened (Hp*Wp) on the lane axis
#   out_ref: (1, C, Lv)   output in padded-flat coordinates (wrapper crops)
#   weights: folded / row-grouped / block-diagonal (see _fold_params)
# ----------------------------------------------------------------------------
def _local_kernel(x_ref, w1_ref, b1_ref, w3_ref, b3_ref, w5_ref, b5_ref,
                  wf_ref, bf_ref, out_ref, *, C, Wp, Lv):

    def mm(w, t):  # (Cout, K) @ (K, Lv) on the MXU, f32 accumulation
        return jnp.dot(w, t, preferred_element_type=jnp.float32)

    def tap(di, dj):
        # output position p (= h*Wp + w) reads x_pad[h+di, w+dj] = flat[p + di*Wp + dj]
        s = di * Wp + dj
        return x_ref[0, :, s:s + Lv]                       # (C, Lv) static lane slice

    acc3 = jnp.zeros((C, Lv), jnp.float32)
    acc5 = jnp.zeros((C, Lv), jnp.float32)
    y1p = None
    for r in range(5):                                      # kernel rows of the 5x5
        # row-grouped taps: contraction = 5*C for the 5x5, 3*C for the 3x3
        t_r = jnp.concatenate([tap(r, dj) for dj in range(5)], axis=0)   # (5C, Lv)
        acc5 = acc5 + mm(w5_ref[r], t_r)
        if 1 <= r <= 3:                                     # inner 3x3 of the 5x5 grid
            acc3 = acc3 + mm(w3_ref[r - 1], t_r[C:4 * C])
        if r == 2:                                          # centre tap == original x
            y1p = mm(w1_ref[...], t_r[2 * C:3 * C])

    # BN bias + ReLU (biases are (C, 1), broadcast over lanes)
    y1 = jnp.maximum(y1p + b1_ref[...], 0.0)
    y3 = jnp.maximum(acc3 + b3_ref[...], 0.0)
    y5 = jnp.maximum(acc5 + b5_ref[...], 0.0)

    # fused fusion1/fusion2 1x1 convs: [Wf1 | Wf2] @ [y3; y5] + (bf1 + bf2)
    y35 = jnp.concatenate([y3, y5], axis=0)                 # (2C, Lv)
    out_ref[0] = y1 + mm(wf_ref[...], y35) + bf_ref[...]


# ----------------------------------------------------------------------------
# Wrapper: padding / flattening, BN folding + weight packing, pallas_call.
# ----------------------------------------------------------------------------
def local_pallas(x_nchw, params):
    x = x_nchw.astype(jnp.float32)
    N, C, H, W = x.shape
    P = 2                                                   # pad of the 5x5 branch
    Hp, Wp = H + 2 * P, W + 2 * P

    Lv = _round_up(H * Wp, 128)                             # lane-dense compute width
    smax = 2 * P * Wp + 2 * P                               # largest tap offset
    Lin = _round_up(smax + Lv, 128)                         # padded flat input length

    xpad = jnp.pad(x, ((0, 0), (0, 0), (P, P), (P, P)))     # (N, C, Hp, Wp)
    xflat = xpad.reshape(N, C, Hp * Wp)
    xflat = jnp.pad(xflat, ((0, 0), (0, 0), (0, Lin - Hp * Wp)))

    folded = _fold_params(params, C)

    kernel = functools.partial(_local_kernel, C=C, Wp=Wp, Lv=Lv)

    def whole(a):
        nd = a.ndim
        return pl.BlockSpec(a.shape, lambda n, _nd=nd: (0,) * _nd)

    in_specs = [pl.BlockSpec((1, C, Lin), lambda n: (n, 0, 0))] + [whole(a) for a in folded]

    out = pl.pallas_call(
        kernel,
        out_shape=jax.ShapeDtypeStruct((N, C, Lv), jnp.float32),
        grid=(N,),
        in_specs=in_specs,
        out_specs=pl.BlockSpec((1, C, Lv), lambda n: (n, 0, 0)),
        compiler_params=pltpu.CompilerParams(
            dimension_semantics=("parallel",),
            vmem_limit_bytes=32 * 1024 * 1024),
    )(xflat, *folded)

    # crop padded-flat coordinates back to (N, C, H, W) -- already NCHW
    out = out[:, :, :H * Wp].reshape(N, C, H, Wp)[:, :, :, :W]
    return out


# ----------------------------------------------------------------------------
# Parameter construction (PyTorch shapes) and eval-mode BN folding / packing.
# ----------------------------------------------------------------------------
def init_params(key, dim):
    c2 = dim // 2
    ks = jax.random.split(key, 14)

    def conv_w(k, cout, cin, kh, kw):
        return 0.1 * jax.random.normal(k, (cout, cin, kh, kw), jnp.float32)

    def bn(k, c):
        k1, k2, k3, k4 = jax.random.split(k, 4)
        gamma = 1.0 + 0.1 * jax.random.normal(k1, (c,), jnp.float32)
        beta = 0.1 * jax.random.normal(k2, (c,), jnp.float32)
        mean = 0.1 * jax.random.normal(k3, (c,), jnp.float32)
        var = 0.5 + jnp.abs(jax.random.normal(k4, (c,), jnp.float32)) * 0.5
        return gamma, beta, mean, var

    return {
        "conv1_w": conv_w(ks[0], dim, dim, 1, 1), "conv1_bn": bn(ks[1], dim),
        "conv3_1_w": conv_w(ks[2], c2, c2, 3, 3), "conv3_1_bn": bn(ks[3], c2),
        "conv3_2_w": conv_w(ks[4], c2, c2, 3, 3), "conv3_2_bn": bn(ks[5], c2),
        "conv5_1_w": conv_w(ks[6], c2, c2, 5, 5), "conv5_1_bn": bn(ks[7], c2),
        "conv5_2_w": conv_w(ks[8], c2, c2, 5, 5), "conv5_2_bn": bn(ks[9], c2),
        "fusion1_w": conv_w(ks[10], dim, dim, 1, 1),
        "fusion1_b": 0.1 * jax.random.normal(ks[11], (dim,), jnp.float32),
        "fusion2_w": conv_w(ks[12], dim, dim, 1, 1),
        "fusion2_b": 0.1 * jax.random.normal(ks[13], (dim,), jnp.float32),
    }


def _row_group(wfull, K):
    # wfull: (Cout, Cin, K, K) -> (K, Cout, K*Cin); column block dj holds wfull[:, :, r, dj]
    rows = []
    for r in range(K):
        rows.append(jnp.concatenate([wfull[:, :, r, dj] for dj in range(K)], axis=1))
    return jnp.stack(rows, axis=0)


def _fold_params(p, C):
    C2 = C // 2

    def sb(bnp):  # eval-mode BN as per-output-channel scale + bias
        g, b, m, v = bnp
        s = g / jnp.sqrt(v + EPS)
        return s, b - m * s

    s1, b1 = sb(p["conv1_bn"])
    w1 = p["conv1_w"][:, :, 0, 0] * s1[:, None]                         # (C, C)

    def merged(w_a, bn_a, w_b, bn_b, K):
        sa, ba = sb(bn_a)
        sc, bc = sb(bn_b)
        wa = w_a * sa[:, None, None, None]
        wb = w_b * sc[:, None, None, None]
        wfull = jnp.zeros((C, C, K, K), jnp.float32)                    # block-diag merge
        wfull = wfull.at[:C2, :C2].set(wa).at[C2:, C2:].set(wb)
        bias = jnp.concatenate([ba, bc])
        return _row_group(wfull, K), bias

    w3g, b3 = merged(p["conv3_1_w"], p["conv3_1_bn"],
                     p["conv3_2_w"], p["conv3_2_bn"], 3)                # (3, C, 3C)
    w5g, b5 = merged(p["conv5_1_w"], p["conv5_1_bn"],
                     p["conv5_2_w"], p["conv5_2_bn"], 5)                # (5, C, 5C)

    wf = jnp.concatenate([p["fusion1_w"][:, :, 0, 0],
                          p["fusion2_w"][:, :, 0, 0]], axis=1)          # (C, 2C)
    bf = p["fusion1_b"] + p["fusion2_b"]

    return (w1, b1[:, None], w3g, b3[:, None], w5g, b5[:, None], wf, bf[:, None])


# ----------------------------------------------------------------------------
# Pure-JAX reference (matches PyTorch eval-mode forward) for verification.
# ----------------------------------------------------------------------------
def local_reference(x, p):
    def conv(a, w, pad):
        return jax.lax.conv_general_dilated(
            a, w, (1, 1), [(pad, pad), (pad, pad)],
            dimension_numbers=("NCHW", "OIHW", "NCHW"))

    def basic(a, w, bnp, pad):
        g, b, m, v = bnp
        y = conv(a, w, pad)
        s = g / jnp.sqrt(v + EPS)
        y = y * s[None, :, None, None] + (b - m * s)[None, :, None, None]
        return jnp.maximum(y, 0.0)

    C = x.shape[1]
    c2 = C // 2
    part1, part2 = x[:, :c2], x[:, c2:]
    x1 = basic(x, p["conv1_w"], p["conv1_bn"], 0)
    c3 = jnp.concatenate([basic(part1, p["conv3_1_w"], p["conv3_1_bn"], 1),
                          basic(part2, p["conv3_2_w"], p["conv3_2_bn"], 1)], axis=1)
    x3 = conv(c3, p["fusion1_w"], 0) + p["fusion1_b"][None, :, None, None]
    c5 = jnp.concatenate([basic(part1, p["conv5_1_w"], p["conv5_1_bn"], 2),
                          basic(part2, p["conv5_2_w"], p["conv5_2_bn"], 2)], axis=1)
    x5 = conv(c5, p["fusion2_w"], 0) + p["fusion2_b"][None, :, None, None]
    return x1 + x3 + x5


if __name__ == "__main__":
    key = jax.random.PRNGKey(0)
    kx, kp = jax.random.split(key)

    N, C, H, W = 2, 8, 16, 16          # small NCHW input, dim must be even
    x = jax.random.normal(kx, (N, C, H, W), jnp.float32)
    params = init_params(kp, C)

    out = local_pallas(x, params)
    out = jax.block_until_ready(out)

    ref = local_reference(x, params)
    err = float(jnp.max(jnp.abs(out - ref)))
    assert out.shape == (N, C, H, W)
    assert jnp.allclose(out, ref, atol=1e-4, rtol=1e-4), f"max abs err {err}"

    print("KERNEL_OK")
</pallas_src>

<mosaic_0001>
module attributes {stable_mosaic.version = 11 : i64} {
  func.func @_local_kernel(%arg0: i32, %arg1: memref<1x8x512xf32, #tpu.memory_space<vmem>>, %arg2: memref<8x8xf32, #tpu.memory_space<vmem>>, %arg3: memref<8x1xf32, #tpu.memory_space<vmem>>, %arg4: memref<3x8x24xf32, #tpu.memory_space<vmem>>, %arg5: memref<8x1xf32, #tpu.memory_space<vmem>>, %arg6: memref<5x8x40xf32, #tpu.memory_space<vmem>>, %arg7: memref<8x1xf32, #tpu.memory_space<vmem>>, %arg8: memref<8x16xf32, #tpu.memory_space<vmem>>, %arg9: memref<8x1xf32, #tpu.memory_space<vmem>>, %arg10: memref<1x8x384xf32, #tpu.memory_space<vmem>>) attributes {dimension_semantics = [#tpu.dimension_semantics<parallel>], iteration_bounds = array<i64: 2>, scalar_prefetch = 0 : i64, scratch_operands = 0 : i64, tpu.core_type = #tpu.core_type<tc>, window_params = [{transform_indices = @transform_0, window_bounds = array<i64: 1, 8, 512>}, {pipeline_mode = #tpu.pipeline_mode<synchronous>, transform_indices = @transform_1, window_bounds = array<i64: 8, 8>}, {pipeline_mode = #tpu.pipeline_mode<synchronous>, transform_indices = @transform_2, window_bounds = array<i64: 8, 1>}, {pipeline_mode = #tpu.pipeline_mode<synchronous>, transform_indices = @transform_3, window_bounds = array<i64: 3, 8, 24>}, {pipeline_mode = #tpu.pipeline_mode<synchronous>, transform_indices = @transform_4, window_bounds = array<i64: 8, 1>}, {pipeline_mode = #tpu.pipeline_mode<synchronous>, transform_indices = @transform_5, window_bounds = array<i64: 5, 8, 40>}, {pipeline_mode = #tpu.pipeline_mode<synchronous>, transform_indices = @transform_6, window_bounds = array<i64: 8, 1>}, {pipeline_mode = #tpu.pipeline_mode<synchronous>, transform_indices = @transform_7, window_bounds = array<i64: 8, 16>}, {pipeline_mode = #tpu.pipeline_mode<synchronous>, transform_indices = @transform_8, window_bounds = array<i64: 8, 1>}, {transform_indices = @transform_9, window_bounds = array<i64: 1, 8, 384>}]} {
    %cst = arith.constant 0.000000e+00 : f32
    %0 = vector.broadcast %cst : f32 to vector<8x384xf32>
    %cst_0 = arith.constant 0.000000e+00 : f32
    %1 = vector.broadcast %cst_0 : f32 to vector<8x384xf32>
    %c0 = arith.constant 0 : index
    %c0_1 = arith.constant 0 : index
    %c0_2 = arith.constant 0 : index
    %2 = vector.load %arg1[%c0, %c0_1, %c0_2] : memref<1x8x512xf32, #tpu.memory_space<vmem>>, vector<1x8x384xf32>
    %3 = vector.shape_cast %2 : vector<1x8x384xf32> to vector<8x384xf32>
    %c0_3 = arith.constant 0 : index
    %c0_4 = arith.constant 0 : index
    %c1 = arith.constant 1 : index
    %4 = vector.load %arg1[%c0_3, %c0_4, %c1] : memref<1x8x512xf32, #tpu.memory_space<vmem>>, vector<1x8x384xf32>
    %5 = vector.shape_cast %4 : vector<1x8x384xf32> to vector<8x384xf32>
    %c0_5 = arith.constant 0 : index
    %c0_6 = arith.constant 0 : index
    %c2 = arith.constant 2 : index
    %6 = vector.load %arg1[%c0_5, %c0_6, %c2] : memref<1x8x512xf32, #tpu.memory_space<vmem>>, vector<1x8x384xf32>
    %7 = vector.shape_cast %6 : vector<1x8x384xf32> to vector<8x384xf32>
    %c0_7 = arith.constant 0 : index
    %c0_8 = arith.constant 0 : index
    %c3 = arith.constant 3 : index
    %8 = vector.load %arg1[%c0_7, %c0_8, %c3] : memref<1x8x512xf32, #tpu.memory_space<vmem>>, vector<1x8x384xf32>
    %9 = vector.shape_cast %8 : vector<1x8x384xf32> to vector<8x384xf32>
    %c0_9 = arith.constant 0 : index
    %c0_10 = arith.constant 0 : index
    %c4 = arith.constant 4 : index
    %10 = vector.load %arg1[%c0_9, %c0_10, %c4] : memref<1x8x512xf32, #tpu.memory_space<vmem>>, vector<1x8x384xf32>
    %11 = vector.shape_cast %10 : vector<1x8x384xf32> to vector<8x384xf32>
    %12 = tpu.concatenate %3, %5, %7, %9, %11 in 0 : vector<8x384xf32>, vector<8x384xf32>, vector<8x384xf32>, vector<8x384xf32>, vector<8x384xf32> -> vector<40x384xf32>
    %c0_11 = arith.constant 0 : index
    %c0_12 = arith.constant 0 : index
    %c0_13 = arith.constant 0 : index
    %13 = vector.load %arg6[%c0_11, %c0_12, %c0_13] : memref<5x8x40xf32, #tpu.memory_space<vmem>>, vector<1x8x40xf32>
    %14 = vector.shape_cast %13 : vector<1x8x40xf32> to vector<8x40xf32>
    %cst_14 = arith.constant dense<0.000000e+00> : vector<8x384xf32>
    %15 = tpu.matmul %14, %12, %cst_14 {dimension_numbers = #tpu.dot_dimension_numbers<[1], [0], [0], [1], [0, 0, 1, 1], [], []>} : vector<8x40xf32>, vector<40x384xf32>, vector<8x384xf32> -> vector<8x384xf32>
    %16 = arith.addf %1, %15 : vector<8x384xf32>
    %c0_15 = arith.constant 0 : index
    %c0_16 = arith.constant 0 : index
    %c20 = arith.constant 20 : index
    %17 = vector.load %arg1[%c0_15, %c0_16, %c20] : memref<1x8x512xf32, #tpu.memory_space<vmem>>, vector<1x8x384xf32>
    %18 = vector.shape_cast %17 : vector<1x8x384xf32> to vector<8x384xf32>
    %c0_17 = arith.constant 0 : index
    %c0_18 = arith.constant 0 : index
    %c21 = arith.constant 21 : index
    %19 = vector.load %arg1[%c0_17, %c0_18, %c21] : memref<1x8x512xf32, #tpu.memory_space<vmem>>, vector<1x8x384xf32>
    %20 = vector.shape_cast %19 : vector<1x8x384xf32> to vector<8x384xf32>
    %c0_19 = arith.constant 0 : index
    %c0_20 = arith.constant 0 : index
    %c22 = arith.constant 22 : index
    %21 = vector.load %arg1[%c0_19, %c0_20, %c22] : memref<1x8x512xf32, #tpu.memory_space<vmem>>, vector<1x8x384xf32>
    %22 = vector.shape_cast %21 : vector<1x8x384xf32> to vector<8x384xf32>
    %c0_21 = arith.constant 0 : index
    %c0_22 = arith.constant 0 : index
    %c23 = arith.constant 23 : index
    %23 = vector.load %arg1[%c0_21, %c0_22, %c23] : memref<1x8x512xf32, #tpu.memory_space<vmem>>, vector<1x8x384xf32>
    %24 = vector.shape_cast %23 : vector<1x8x384xf32> to vector<8x384xf32>
    %c0_23 = arith.constant 0 : index
    %c0_24 = arith.constant 0 : index
    %c24 = arith.constant 24 : index
    %25 = vector.load %arg1[%c0_23, %c0_24, %c24] : memref<1x8x512xf32, #tpu.memory_space<vmem>>, vector<1x8x384xf32>
    %26 = vector.shape_cast %25 : vector<1x8x384xf32> to vector<8x384xf32>
    %27 = tpu.concatenate %18, %20, %22, %24, %26 in 0 : vector<8x384xf32>, vector<8x384xf32>, vector<8x384xf32>, vector<8x384xf32>, vector<8x384xf32> -> vector<40x384xf32>
    %c1_25 = arith.constant 1 : index
    %c0_26 = arith.constant 0 : index
    %c0_27 = arith.constant 0 : index
    %28 = vector.load %arg6[%c1_25, %c0_26, %c0_27] : memref<5x8x40xf32, #tpu.memory_space<vmem>>, vector<1x8x40xf32>
    %29 = vector.shape_cast %28 : vector<1x8x40xf32> to vector<8x40xf32>
    %cst_28 = arith.constant dense<0.000000e+00> : vector<8x384xf32>
    %30 = tpu.matmul %29, %27, %cst_28 {dimension_numbers = #tpu.dot_dimension_numbers<[1], [0], [0], [1], [0, 0, 1, 1], [], []>} : vector<8x40xf32>, vector<40x384xf32>, vector<8x384xf32> -> vector<8x384xf32>
    %31 = arith.addf %16, %30 : vector<8x384xf32>
    %c0_29 = arith.constant 0 : index
    %c0_30 = arith.constant 0 : index
    %c0_31 = arith.constant 0 : index
    %32 = vector.load %arg4[%c0_29, %c0_30, %c0_31] : memref<3x8x24xf32, #tpu.memory_space<vmem>>, vector<1x8x24xf32>
    %33 = vector.shape_cast %32 : vector<1x8x24xf32> to vector<8x24xf32>
    %34 = vector.extract_strided_slice %27 {offsets = [8, 0], sizes = [24, 384], strides = [1, 1]} : vector<40x384xf32> to vector<24x384xf32>
    %cst_32 = arith.constant dense<0.000000e+00> : vector<8x384xf32>
    %35 = tpu.matmul %33, %34, %cst_32 {dimension_numbers = #tpu.dot_dimension_numbers<[1], [0], [0], [1], [0, 0, 1, 1], [], []>} : vector<8x24xf32>, vector<24x384xf32>, vector<8x384xf32> -> vector<8x384xf32>
    %36 = arith.addf %0, %35 : vector<8x384xf32>
    %c0_33 = arith.constant 0 : index
    %c0_34 = arith.constant 0 : index
    %c40 = arith.constant 40 : index
    %37 = vector.load %arg1[%c0_33, %c0_34, %c40] : memref<1x8x512xf32, #tpu.memory_space<vmem>>, vector<1x8x384xf32>
    %38 = vector.shape_cast %37 : vector<1x8x384xf32> to vector<8x384xf32>
    %c0_35 = arith.constant 0 : index
    %c0_36 = arith.constant 0 : index
    %c41 = arith.constant 41 : index
    %39 = vector.load %arg1[%c0_35, %c0_36, %c41] : memref<1x8x512xf32, #tpu.memory_space<vmem>>, vector<1x8x384xf32>
    %40 = vector.shape_cast %39 : vector<1x8x384xf32> to vector<8x384xf32>
    %c0_37 = arith.constant 0 : index
    %c0_38 = arith.constant 0 : index
    %c42 = arith.constant 42 : index
    %41 = vector.load %arg1[%c0_37, %c0_38, %c42] : memref<1x8x512xf32, #tpu.memory_space<vmem>>, vector<1x8x384xf32>
    %42 = vector.shape_cast %41 : vector<1x8x384xf32> to vector<8x384xf32>
    %c0_39 = arith.constant 0 : index
    %c0_40 = arith.constant 0 : index
    %c43 = arith.constant 43 : index
    %43 = vector.load %arg1[%c0_39, %c0_40, %c43] : memref<1x8x512xf32, #tpu.memory_space<vmem>>, vector<1x8x384xf32>
    %44 = vector.shape_cast %43 : vector<1x8x384xf32> to vector<8x384xf32>
    %c0_41 = arith.constant 0 : index
    %c0_42 = arith.constant 0 : index
    %c44 = arith.constant 44 : index
    %45 = vector.load %arg1[%c0_41, %c0_42, %c44] : memref<1x8x512xf32, #tpu.memory_space<vmem>>, vector<1x8x384xf32>
    %46 = vector.shape_cast %45 : vector<1x8x384xf32> to vector<8x384xf32>
    %47 = tpu.concatenate %38, %40, %42, %44, %46 in 0 : vector<8x384xf32>, vector<8x384xf32>, vector<8x384xf32>, vector<8x384xf32>, vector<8x384xf32> -> vector<40x384xf32>
    %c2_43 = arith.constant 2 : index
    %c0_44 = arith.constant 0 : index
    %c0_45 = arith.constant 0 : index
    %48 = vector.load %arg6[%c2_43, %c0_44, %c0_45] : memref<5x8x40xf32, #tpu.memory_space<vmem>>, vector<1x8x40xf32>
    %49 = vector.shape_cast %48 : vector<1x8x40xf32> to vector<8x40xf32>
    %cst_46 = arith.constant dense<0.000000e+00> : vector<8x384xf32>
    %50 = tpu.matmul %49, %47, %cst_46 {dimension_numbers = #tpu.dot_dimension_numbers<[1], [0], [0], [1], [0, 0, 1, 1], [], []>} : vector<8x40xf32>, vector<40x384xf32>, vector<8x384xf32> -> vector<8x384xf32>
    %51 = arith.addf %31, %50 : vector<8x384xf32>
    %c1_47 = arith.constant 1 : index
    %c0_48 = arith.constant 0 : index
    %c0_49 = arith.constant 0 : index
    %52 = vector.load %arg4[%c1_47, %c0_48, %c0_49] : memref<3x8x24xf32, #tpu.memory_space<vmem>>, vector<1x8x24xf32>
    %53 = vector.shape_cast %52 : vector<1x8x24xf32> to vector<8x24xf32>
    %54 = vector.extract_strided_slice %47 {offsets = [8, 0], sizes = [24, 384], strides = [1, 1]} : vector<40x384xf32> to vector<24x384xf32>
    %cst_50 = arith.constant dense<0.000000e+00> : vector<8x384xf32>
    %55 = tpu.matmul %53, %54, %cst_50 {dimension_numbers = #tpu.dot_dimension_numbers<[1], [0], [0], [1], [0, 0, 1, 1], [], []>} : vector<8x24xf32>, vector<24x384xf32>, vector<8x384xf32> -> vector<8x384xf32>
    %56 = arith.addf %36, %55 : vector<8x384xf32>
    %c0_51 = arith.constant 0 : index
    %c0_52 = arith.constant 0 : index
    %57 = vector.load %arg2[%c0_51, %c0_52] : memref<8x8xf32, #tpu.memory_space<vmem>>, vector<8x8xf32>
    %58 = vector.extract_strided_slice %47 {offsets = [16, 0], sizes = [8, 384], strides = [1, 1]} : vector<40x384xf32> to vector<8x384xf32>
    %cst_53 = arith.constant dense<0.000000e+00> : vector<8x384xf32>
    %59 = tpu.matmul %57, %58, %cst_53 {dimension_numbers = #tpu.dot_dimension_numbers<[1], [0], [0], [1], [0, 0, 1, 1], [], []>} : vector<8x8xf32>, vector<8x384xf32>, vector<8x384xf32> -> vector<8x384xf32>
    %c0_54 = arith.constant 0 : index
    %c0_55 = arith.constant 0 : index
    %c60 = arith.constant 60 : index
    %60 = vector.load %arg1[%c0_54, %c0_55, %c60] : memref<1x8x512xf32, #tpu.memory_space<vmem>>, vector<1x8x384xf32>
    %61 = vector.shape_cast %60 : vector<1x8x384xf32> to vector<8x384xf32>
    %c0_56 = arith.constant 0 : index
    %c0_57 = arith.constant 0 : index
    %c61 = arith.constant 61 : index
    %62 = vector.load %arg1[%c0_56, %c0_57, %c61] : memref<1x8x512xf32, #tpu.memory_space<vmem>>, vector<1x8x384xf32>
    %63 = vector.shape_cast %62 : vector<1x8x384xf32> to vector<8x384xf32>
    %c0_58 = arith.constant 0 : index
    %c0_59 = arith.constant 0 : index
    %c62 = arith.constant 62 : index
    %64 = vector.load %arg1[%c0_58, %c0_59, %c62] : memref<1x8x512xf32, #tpu.memory_space<vmem>>, vector<1x8x384xf32>
    %65 = vector.shape_cast %64 : vector<1x8x384xf32> to vector<8x384xf32>
    %c0_60 = arith.constant 0 : index
    %c0_61 = arith.constant 0 : index
    %c63 = arith.constant 63 : index
    %66 = vector.load %arg1[%c0_60, %c0_61, %c63] : memref<1x8x512xf32, #tpu.memory_space<vmem>>, vector<1x8x384xf32>
    %67 = vector.shape_cast %66 : vector<1x8x384xf32> to vector<8x384xf32>
    %c0_62 = arith.constant 0 : index
    %c0_63 = arith.constant 0 : index
    %c64 = arith.constant 64 : index
    %68 = vector.load %arg1[%c0_62, %c0_63, %c64] : memref<1x8x512xf32, #tpu.memory_space<vmem>>, vector<1x8x384xf32>
    %69 = vector.shape_cast %68 : vector<1x8x384xf32> to vector<8x384xf32>
    %70 = tpu.concatenate %61, %63, %65, %67, %69 in 0 : vector<8x384xf32>, vector<8x384xf32>, vector<8x384xf32>, vector<8x384xf32>, vector<8x384xf32> -> vector<40x384xf32>
    %c3_64 = arith.constant 3 : index
    %c0_65 = arith.constant 0 : index
    %c0_66 = arith.constant 0 : index
    %71 = vector.load %arg6[%c3_64, %c0_65, %c0_66] : memref<5x8x40xf32, #tpu.memory_space<vmem>>, vector<1x8x40xf32>
    %72 = vector.shape_cast %71 : vector<1x8x40xf32> to vector<8x40xf32>
    %cst_67 = arith.constant dense<0.000000e+00> : vector<8x384xf32>
    %73 = tpu.matmul %72, %70, %cst_67 {dimension_numbers = #tpu.dot_dimension_numbers<[1], [0], [0], [1], [0, 0, 1, 1], [], []>} : vector<8x40xf32>, vector<40x384xf32>, vector<8x384xf32> -> vector<8x384xf32>
    %74 = arith.addf %51, %73 : vector<8x384xf32>
    %c2_68 = arith.constant 2 : index
    %c0_69 = arith.constant 0 : index
    %c0_70 = arith.constant 0 : index
    %75 = vector.load %arg4[%c2_68, %c0_69, %c0_70] : memref<3x8x24xf32, #tpu.memory_space<vmem>>, vector<1x8x24xf32>
    %76 = vector.shape_cast %75 : vector<1x8x24xf32> to vector<8x24xf32>
    %77 = vector.extract_strided_slice %70 {offsets = [8, 0], sizes = [24, 384], strides = [1, 1]} : vector<40x384xf32> to vector<24x384xf32>
    %cst_71 = arith.constant dense<0.000000e+00> : vector<8x384xf32>
    %78 = tpu.matmul %76, %77, %cst_71 {dimension_numbers = #tpu.dot_dimension_numbers<[1], [0], [0], [1], [0, 0, 1, 1], [], []>} : vector<8x24xf32>, vector<24x384xf32>, vector<8x384xf32> -> vector<8x384xf32>
    %79 = arith.addf %56, %78 : vector<8x384xf32>
    %c0_72 = arith.constant 0 : index
    %c0_73 = arith.constant 0 : index
    %c80 = arith.constant 80 : index
    %80 = vector.load %arg1[%c0_72, %c0_73, %c80] : memref<1x8x512xf32, #tpu.memory_space<vmem>>, vector<1x8x384xf32>
    %81 = vector.shape_cast %80 : vector<1x8x384xf32> to vector<8x384xf32>
    %c0_74 = arith.constant 0 : index
    %c0_75 = arith.constant 0 : index
    %c81 = arith.constant 81 : index
    %82 = vector.load %arg1[%c0_74, %c0_75, %c81] : memref<1x8x512xf32, #tpu.memory_space<vmem>>, vector<1x8x384xf32>
    %83 = vector.shape_cast %82 : vector<1x8x384xf32> to vector<8x384xf32>
    %c0_76 = arith.constant 0 : index
    %c0_77 = arith.constant 0 : index
    %c82 = arith.constant 82 : index
    %84 = vector.load %arg1[%c0_76, %c0_77, %c82] : memref<1x8x512xf32, #tpu.memory_space<vmem>>, vector<1x8x384xf32>
    %85 = vector.shape_cast %84 : vector<1x8x384xf32> to vector<8x384xf32>
    %c0_78 = arith.constant 0 : index
    %c0_79 = arith.constant 0 : index
    %c83 = arith.constant 83 : index
    %86 = vector.load %arg1[%c0_78, %c0_79, %c83] : memref<1x8x512xf32, #tpu.memory_space<vmem>>, vector<1x8x384xf32>
    %87 = vector.shape_cast %86 : vector<1x8x384xf32> to vector<8x384xf32>
    %c0_80 = arith.constant 0 : index
    %c0_81 = arith.constant 0 : index
    %c84 = arith.constant 84 : index
    %88 = vector.load %arg1[%c0_80, %c0_81, %c84] : memref<1x8x512xf32, #tpu.memory_space<vmem>>, vector<1x8x384xf32>
    %89 = vector.shape_cast %88 : vector<1x8x384xf32> to vector<8x384xf32>
    %90 = tpu.concatenate %81, %83, %85, %87, %89 in 0 : vector<8x384xf32>, vector<8x384xf32>, vector<8x384xf32>, vector<8x384xf32>, vector<8x384xf32> -> vector<40x384xf32>
    %c4_82 = arith.constant 4 : index
    %c0_83 = arith.constant 0 : index
    %c0_84 = arith.constant 0 : index
    %91 = vector.load %arg6[%c4_82, %c0_83, %c0_84] : memref<5x8x40xf32, #tpu.memory_space<vmem>>, vector<1x8x40xf32>
    %92 = vector.shape_cast %91 : vector<1x8x40xf32> to vector<8x40xf32>
    %cst_85 = arith.constant dense<0.000000e+00> : vector<8x384xf32>
    %93 = tpu.matmul %92, %90, %cst_85 {dimension_numbers = #tpu.dot_dimension_numbers<[1], [0], [0], [1], [0, 0, 1, 1], [], []>} : vector<8x40xf32>, vector<40x384xf32>, vector<8x384xf32> -> vector<8x384xf32>
    %94 = arith.addf %74, %93 : vector<8x384xf32>
    %c0_86 = arith.constant 0 : index
    %c0_87 = arith.constant 0 : index
    %95 = vector.load %arg3[%c0_86, %c0_87] : memref<8x1xf32, #tpu.memory_space<vmem>>, vector<8x1xf32>
    %96 = vector.broadcast %95 : vector<8x1xf32> to vector<8x384xf32>
    %97 = arith.addf %59, %96 : vector<8x384xf32>
    %cst_88 = arith.constant 0.000000e+00 : f32
    %98 = vector.broadcast %cst_88 : f32 to vector<8x384xf32>
    %99 = arith.maximumf %97, %98 : vector<8x384xf32>
    %c0_89 = arith.constant 0 : index
    %c0_90 = arith.constant 0 : index
    %100 = vector.load %arg5[%c0_89, %c0_90] : memref<8x1xf32, #tpu.memory_space<vmem>>, vector<8x1xf32>
    %101 = vector.broadcast %100 : vector<8x1xf32> to vector<8x384xf32>
    %102 = arith.addf %79, %101 : vector<8x384xf32>
    %cst_91 = arith.constant 0.000000e+00 : f32
    %103 = vector.broadcast %cst_91 : f32 to vector<8x384xf32>
    %104 = arith.maximumf %102, %103 : vector<8x384xf32>
    %c0_92 = arith.constant 0 : index
    %c0_93 = arith.constant 0 : index
    %105 = vector.load %arg7[%c0_92, %c0_93] : memref<8x1xf32, #tpu.memory_space<vmem>>, vector<8x1xf32>
    %106 = vector.broadcast %105 : vector<8x1xf32> to vector<8x384xf32>
    %107 = arith.addf %94, %106 : vector<8x384xf32>
    %cst_94 = arith.constant 0.000000e+00 : f32
    %108 = vector.broadcast %cst_94 : f32 to vector<8x384xf32>
    %109 = arith.maximumf %107, %108 : vector<8x384xf32>
    %110 = tpu.concatenate %104, %109 in 0 : vector<8x384xf32>, vector<8x384xf32> -> vector<16x384xf32>
    %c0_95 = arith.constant 0 : index
    %c0_96 = arith.constant 0 : index
    %111 = vector.load %arg8[%c0_95, %c0_96] : memref<8x16xf32, #tpu.memory_space<vmem>>, vector<8x16xf32>
    %cst_97 = arith.constant dense<0.000000e+00> : vector<8x384xf32>
    %112 = tpu.matmul %111, %110, %cst_97 {dimension_numbers = #tpu.dot_dimension_numbers<[1], [0], [0], [1], [0, 0, 1, 1], [], []>} : vector<8x16xf32>, vector<16x384xf32>, vector<8x384xf32> -> vector<8x384xf32>
    %113 = arith.addf %99, %112 : vector<8x384xf32>
    %c0_98 = arith.constant 0 : index
    %c0_99 = arith.constant 0 : index
    %114 = vector.load %arg9[%c0_98, %c0_99] : memref<8x1xf32, #tpu.memory_space<vmem>>, vector<8x1xf32>
    %115 = vector.broadcast %114 : vector<8x1xf32> to vector<8x384xf32>
    %116 = arith.addf %113, %115 : vector<8x384xf32>
    %c0_100 = arith.constant 0 : index
    %c0_101 = arith.constant 0 : index
    %c0_102 = arith.constant 0 : index
    %117 = vector.load %arg10[%c0_100, %c0_101, %c0_102] : memref<1x8x384xf32, #tpu.memory_space<vmem>>, vector<1x8x384xf32>
    %118 = vector.shape_cast %117 : vector<1x8x384xf32> to vector<8x384xf32>
    %119 = vector.shape_cast %116 : vector<8x384xf32> to vector<1x8x384xf32>
    tpu.vector_store %arg10[%c0_100, %c0_101, %c0_102], %119 {strides = array<i32>} : memref<1x8x384xf32, #tpu.memory_space<vmem>>, vector<1x8x384xf32>,
    return
  }
  func.func @transform_0(%arg0: i32) -> (i32, i32, i32) {
    %c0_i32 = arith.constant 0 : i32
    %c0_i32_0 = arith.constant 0 : i32
    %c0_i32_1 = arith.constant 0 : i32
    return %arg0, %c0_i32, %c0_i32_0 : i32, i32, i32
  }
  func.func @transform_1(%arg0: i32) -> (i32, i32) {
    %c0_i32 = arith.constant 0 : i32
    %c0_i32_0 = arith.constant 0 : i32
    %c0_i32_1 = arith.constant 0 : i32
    return %c0_i32, %c0_i32_0 : i32, i32
  }
  func.func @transform_2(%arg0: i32) -> (i32, i32) {
    %c0_i32 = arith.constant 0 : i32
    %c0_i32_0 = arith.constant 0 : i32
    %c0_i32_1 = arith.constant 0 : i32
    return %c0_i32, %c0_i32_0 : i32, i32
  }
  func.func @transform_3(%arg0: i32) -> (i32, i32, i32) {
    %c0_i32 = arith.constant 0 : i32
    %c0_i32_0 = arith.constant 0 : i32
    %c0_i32_1 = arith.constant 0 : i32
    %c0_i32_2 = arith.constant 0 : i32
    return %c0_i32, %c0_i32_0, %c0_i32_1 : i32, i32, i32
  }
  func.func @transform_4(%arg0: i32) -> (i32, i32) {
    %c0_i32 = arith.constant 0 : i32
    %c0_i32_0 = arith.constant 0 : i32
    %c0_i32_1 = arith.constant 0 : i32
    return %c0_i32, %c0_i32_0 : i32, i32
  }
  func.func @transform_5(%arg0: i32) -> (i32, i32, i32) {
    %c0_i32 = arith.constant 0 : i32
    %c0_i32_0 = arith.constant 0 : i32
    %c0_i32_1 = arith.constant 0 : i32
    %c0_i32_2 = arith.constant 0 : i32
    return %c0_i32, %c0_i32_0, %c0_i32_1 : i32, i32, i32
  }
  func.func @transform_6(%arg0: i32) -> (i32, i32) {
    %c0_i32 = arith.constant 0 : i32
    %c0_i32_0 = arith.constant 0 : i32
    %c0_i32_1 = arith.constant 0 : i32
    return %c0_i32, %c0_i32_0 : i32, i32
  }
  func.func @transform_7(%arg0: i32) -> (i32, i32) {
    %c0_i32 = arith.constant 0 : i32
    %c0_i32_0 = arith.constant 0 : i32
    %c0_i32_1 = arith.constant 0 : i32
    return %c0_i32, %c0_i32_0 : i32, i32
  }
  func.func @transform_8(%arg0: i32) -> (i32, i32) {
    %c0_i32 = arith.constant 0 : i32
    %c0_i32_0 = arith.constant 0 : i32
    %c0_i32_1 = arith.constant 0 : i32
    return %c0_i32, %c0_i32_0 : i32, i32
  }
  func.func @transform_9(%arg0: i32) -> (i32, i32, i32) {
    %c0_i32 = arith.constant 0 : i32
    %c0_i32_0 = arith.constant 0 : i32
    %c0_i32_1 = arith.constant 0 : i32
    return %arg0, %c0_i32, %c0_i32_0 : i32, i32, i32
  }
}

</mosaic_0001>

<bundles_post_ra>
// kernel: tpu_custom_call.1
= control target key start
LH: loop header
LB: loop body
LE: loop exit
PB: predicated region body
PF: predicated region fallthrough
CT: control target
= control target key end

     0   :  { %14 = vsyncpa [#allocation3], 0  ;;  %s3768_s0 = inlined_call_operand.hbm [shape: f32[2,8,512], index: 0, kind: input, shape index: {}]   ;;  %s3769_s1 = inlined_call_operand.vmem [shape: f32[8,8], index: 1, kind: input, shape index: {}]   ;;  %s3770_s2 = inlined_call_operand.vmem [shape: f32[8,1], index: 2, kind: input, shape index: {}]   ;;  %s3771_s3 = inlined_call_operand.hbm [shape: f32[3,8,24], index: 3, kind: input, shape index: {}]   ;;  %s3772_s4 = inlined_call_operand.vmem [shape: f32[8,1], index: 4, kind: input, shape index: {}]   ;;  %s3773_s5 = inlined_call_operand.vmem [shape: f32[5,8,40], index: 5, kind: input, shape index: {}]   ;;  %s3774_s6 = inlined_call_operand.vmem [shape: f32[8,1], index: 6, kind: input, shape index: {}]   ;;  %s3775_s7 = inlined_call_operand.vmem [shape: f32[8,16], index: 7, kind: input, shape index: {}]   ;;  %s3776_s8 = inlined_call_operand.vmem [shape: f32[8,1], index: 8, kind: input, shape index: {}]   ;;  %s3777_s9 = inlined_call_operand.hbm [shape: f32[2,8,384], index: 9, kind: output, shape index: {}]  }
   0x1   :  { %16 = vsyncpa [#allocation3 + $0x1], 0 }
   0x2   :  { %17 = vsyncpa [#allocation6], 0 }
   0x3   :  { %18 = vsyncpa [#allocation4], 0 }
   0x4   :  { %20 = vsyncpa [#allocation4 + $0x1], 0  ;;  %s3035_s30 = smov 0   ;;  %s3037_s10 = smov 0  }
   0x5   :  { %s3039_s11 = smov 0   ;;  %s3041_s12 = smov 0  }
   0x6 LB: > { %s3056_s13 = sadd.s32 4294967295, %s2966_s12   ;;  %s2334_s14 = sadd.s32 4294967294, %s2966_s12   ;;  %s2966_s12 = sphi %s3041_s12, %s3800_s12   ;;  %s2962_s11 = sphi %s3039_s11, %s3803_s11   ;;  %s2958_s10 = sphi %s3037_s10, %s3802_s10   ;;  %s2954_s30 = sphi %s3035_s30, %s3801_s30  }
   0x7   : > { %p46_p0 = scmp.ne.s32.totalorder %s2958_s10, %s2954_s30  ;;  %p3778_p1 = scmp.eq.s32.totalorder %s3056_s13, 0 }
   0x8   : > { %p244_p3 = scmp.eq.s32.totalorder %s2334_s14, 1  ;;  %p2335_p5 = scmp.ge.s32.totalorder %s2966_s12, 1 }
   0x9   : > { %p3065_p4 = por %p3778_p1, %p46_p0  ;;  %p251_p7 = scmp.lt.s32.totalorder %s2966_s12, 3 }
   0xa   : > { %p3070_p6 = por %p244_p3, %p46_p0  ;;  %s2968_s18 = smov [#allocation5]  }
   0xb   : > { %s3784_s15 = scalar_select %p3065_p4, 1, 0 }
   0xc   : > { %s3785_s16 = scalar_select %p3070_p6, 1, 0 }
   0xd   : > { %p3075_p8 = pnand %p2335_p5, %p251_p7  ;;  %s269_s19 = sshll.u32 %s2968_s18, 4  ;;  %s3079_s19 = int_to_ptr.vmem [resolvable:$true] %s269_s19 }
   0xe   : > { %3786 = sst [smem:[#allocation11_spill]] %s3785_s16  ;;  %s3091_s21 = sadd.s32 1, %s2966_s12  }
   0xf   : > { %s3787_s17 = scalar_select %p3075_p8, 1, 0 }
  0x10   : > { %p2643_p9 = pneg %p3075_p8  ;;  %3789 = sst [smem:[#allocation12_spill]] %s3091_s21 }
  0x11   : > { %s33_s22 = sadd.s32 1, %s2962_s11  ;;  %s30_s23 = ssub.s32 %s2966_s12, %s3091_s21 }
  0x12   : > { %p3086_p11 = pnand %p2643_p9, %p3778_p1  ;;  %s2838_s26 = scalar_lea.hbm %s3771_s3, 384 }
  0x13   : > { %p2839_p12 = scmp.ne.s32.totalorder %s3771_s3, %s2838_s26  ;;  %p2845_p5 = scmp.lt.u32.totalorder %s2838_s26, %s3771_s3 }
  0x14   : > { %p2840_p13 = pneg %p3086_p11 }
  0x16   : > { %p2841_p0 = pnand %p2840_p13, %p2839_p12 }
  0x18   : > { %p2842_p3 = pneg %p2841_p0 }
  0x1a   : > { %p2847_p7 = pnand %p2845_p5, %p2842_p3 }
  0x1c   : > { %2850 = shalt.err (!%p2847_p7)
}
  0x1d   : > { %s2851_s18 = scalar_lea.vmem %s3079_s19, 384  ;;  %p2859_p2 = scmp.lt.s32.totalorder %s3079_s19, %s3079_s19 }
  0x1e   : > { %p2852_p9 = scmp.ne.s32.totalorder %s3079_s19, %s2851_s18  ;;  %p2860_p6 = scmp.lt.s32.totalorder %s2851_s18, %s2851_s18 }
  0x20   : > { %p2854_p10 = pnand %p2852_p9, %p2840_p13  ;;  %p2861_p4 = por %p2860_p6, %p2859_p2 }
  0x22   : > { %p2855_p1 = pneg %p2854_p10 }
  0x24   : > { %p2862_p8 = pnand %p2861_p4, %p2855_p1 }
  0x26   : > { %2865 = shalt.err (!%p2862_p8)
}
  0x27   : > { %s2969_s24 = smov 128   ;;  %s2970_s25 = smov 8  }
  0x28   : > { %2646 = dma.hbm_to_vmem [thread:$0]  (!%p3086_p11), %s3771_s3, 384, %s3079_s19, [#allocation6], %s2969_s24, %s2969_s24, %s2970_s25  }
  0x29   : > { %p31_p2 = scmp.eq.s32.totalorder %s30_s23, 0  ;;  %p40_p1 = scmp.ne.s32.totalorder %s2962_s11, %s2958_s10 }
  0x2a   : > { %p41_p4 = scmp.eq.s32.totalorder %s2966_s12, 0  ;;  %p2656_p6 = scmp.lt.s32.totalorder %s2966_s12, 2 }
  0x2b   : > { %s3122_s28 = scalar_select %p31_p2, %s2962_s11, %s33_s22  }
  0x2c   : > { %p42_p8 = por %p41_p4, %p40_p1  ;;  %p3790_p10 = scmp.eq.s32.totalorder %s3056_s13, 1 }
  0x2d   : > { %s298_s14 = sand.u32 1, %s2962_s11   ;;  %s2371_s18 = sshll.u32 %s2966_s12, 9 }
  0x2e   : > { %p3126_p12 = por %p3790_p10, %p40_p1  ;;  %s2338_s21 = sshll.u32 %s298_s14, 5 }
  0x2f   : > { %s3135_s26 = scalar_lea.hbm %s3768_s0, %s2371_s18  ;;  %s302_s19 = scalar_lea.vmem [#allocation2], %s2338_s21 }
  0x30   : > { %s310_s22 = sshll.u32 %s302_s19, 4  ;;  %p3137_p11 = pnand %p2656_p6, %p42_p8  ;;  %s3141_s22 = int_to_ptr.vmem [resolvable:$true] %s310_s22 }
  0x31   : > { %s299_s24 = scalar_lea.sflag [#allocation3], %s298_s14  ;;  %s2866_s25 = scalar_lea.hbm %s3135_s26, 512 }
  0x32   : > { %p2867_p13 = scmp.ne.s32.totalorder %s3135_s26, %s2866_s25  ;;  %p2868_p0 = pneg %p3137_p11 }
  0x33   : > { %s2871_s27 = scalar_lea.hbm %s3768_s0, 1024  ;;  %p2872_p7 = scmp.lt.u32.totalorder %s3135_s26, %s3768_s0 }
  0x34   : > { %p2869_p3 = pnand %p2868_p0, %p2867_p13  ;;  %p2873_p9 = scmp.lt.u32.totalorder %s2871_s27, %s2866_s25 }
  0x35   : > { %p2875_p1 = scmp.lt.u32.totalorder %s2866_s25, %s3135_s26 }
  0x36   : > { %p2870_p5 = pneg %p2869_p3  ;;  %p2874_p2 = por %p2873_p9, %p2872_p7 }
  0x38   : > { %p2876_p4 = por %p2875_p1, %p2874_p2 }
  0x3a   : > { %p2877_p6 = pnand %p2876_p4, %p2870_p5 }
  0x3c   : > { %2880 = shalt.err (!%p2877_p6)
}
  0x3d   : > { %s2881_s14 = scalar_lea.vmem %s3141_s22, 512  ;;  %s2971_s19 = smov [#allocation2]  }
  0x3e   : > { %p2882_p8 = scmp.ne.s32.totalorder %s3141_s22, %s2881_s14  ;;  %s2886_s16 = sshll.u32 %s2971_s19, 4  ;;  %s2887_s16 = int_to_ptr.vmem [resolvable:$false] %s2886_s16 }
  0x3f   : > { %s2888_s21 = scalar_lea.vmem %s2887_s16, 1024  ;;  %p2889_p3 = scmp.lt.s32.totalorder %s3141_s22, %s2887_s16 }
  0x40   : > { %p2884_p10 = pnand %p2882_p8, %p2868_p0  ;;  %p2890_p7 = scmp.lt.s32.totalorder %s2888_s21, %s2881_s14 }
  0x42   : > { %p2885_p13 = pneg %p2884_p10  ;;  %p2891_p9 = por %p2890_p7, %p2889_p3 }
  0x44   : > { %p2892_p2 = pnand %p2891_p9, %p2885_p13 }
  0x46   : > { %2895 = shalt.err (!%p2892_p2)
}
  0x47   : > { %2650 = dma.hbm_to_vmem [thread:$0]  (!%p3137_p11), %s3135_s26, 512, %s3141_s22, %s299_s24  }
  0x48   : > { %p3793_p5 = scmp.ne.s32.totalorder %s3787_s17, 0 }
  0x49   : > { %s3171_s25 = sand.u32 (!%p3793_p5), 1, %s2958_s10   ;;  %p3794_p0 = scmp.ne.s32.totalorder (!%p3793_p5), %s3784_s15, 0 }
  0x4a   : > { %319 = sbr.rel (%p3793_p5) target bundleno = 903 (0x387), region = 56  ;;  %s2342_s27 = sshll.u32 (!%p3793_p5), %s3171_s25, 5 }
  0x4b   : > { %s322_s18 = scalar_lea.sflag (!%p3793_p5), [#allocation3], %s3171_s25  ;;  %s325_s20 = scalar_lea.vmem (!%p3793_p5), [#allocation2], %s2342_s27 }
  0x51   : > { %2941 = dma.done.wait (%p3794_p0), %s322_s18, 512  }
  0x52   : > { %2943 = vsyncadd (%p3794_p0), %s322_s18, 4294966784  ;;  %p3795_p1 = scmp.eq.s32.totalorder %s3056_s13, 0 }
  0x54   : > { %2945 = dma.done.wait (%p3795_p1), [#allocation6], 384   ;;  %p3796_p11 = pmov %p3795_p1 }
  0x55   : > { %v3183_v0 = vld [vmem:[%s325_s20 + $0x8] sm:$0xff]  ;;  %v3185_v1 = vld [vmem:[%s325_s20 + $0x10] sm:$0xff]  ;;  %v3187_v2 = vld [vmem:[%s325_s20] sm:$0xff]  ;;  %s2972_s17 = smov 126   ;;  %s2973_s15 = smov 127   ;;  %vm383_vm0 = vcmask 1039360  }
  0x56   : > { %2947 = vsyncadd (%p3796_p11), [#allocation6], 4294966912  ;;  %392 = vrot.lane.b32.xlu1 %v3183_v0, %s2972_s17  ;;  %v3192_v3 = vpack.i.bf16 %v3185_v1, %v3183_v0  ;;  %v370_v4 = vld [vmem:[%s325_s20 + $0x18] sm:$0xff]  ;;  %s2974_s26 = smov 125   ;;  %s2975_s22 = smov 124   ;;  %vm398_vm1 = vcmask 1031168  }
  0x57   : > { %v2711_v5 = vpack.i.bf16 %v3187_v2, %v370_v4  ;;  %s2976_s23 = smov 108   ;;  %s2977_s24 = smov 88   ;;  %vm413_vm2 = vcmask 1022976   ;;  %vm428_vm3 = vcmask 1014784   ;;  %v2979_v37 = vmov 0.0|0.0   ;;  %v2054_v52 = vld [vmem:[%s3772_s4] sm:$0xff] }
  0x58   : > { %2707 = vrot.lane.b32.xlu0 %v3192_v3, %s2973_s15  ;;  %s2978_s14 = smov 68   ;;  %2531 = vmatprep.subr.bf16.mxu1 %v2979_v37  ;;  %v2980_v43 = vmov 0.0   ;;  %vm2981_vm4 = vmmov 0   ;;  %s2982_s19 = smov 48   ;;  %v2983_v53 = vmov 0   ;;  %v2066_v54 = vld [vmem:[%s3774_s6] sm:$0xff] }
  0x59   : > { %577 = vmatprep.mubr.f32.mxu0 %v2980_v43  ;;  %2429 = vmatprep.mubr.msk.f32.mxu1 %vm2981_vm4, %v2980_v43  ;;  %v2227_v56 = vld [vmem:[%s3776_s8] sm:$0xff]  ;;  %vm478_vm5 = vcmask 883712   ;;  %vm509_vm6 = vcmask 326656   ;;  %vm841_vm7 = vcmask 719872   ;;  %vm1021_vm8 = vcmask 195584   ;;  %s2984_s20 = smov [#allocation7]  }
  0x5a   : > { %394 = vrot.lane.b32.xlu1 %v3185_v1, %s2972_s17  ;;  %2836 = vset.pattern.permute.xlu0 %v2983_v53  ;;  %v1900_v58 = vld [vmem:[%s3770_s2] sm:$0xff]  ;;  %vm1353_vm9 = vcmask 556032   ;;  %vm1722_vm10 = vcmask 392192   ;;  %vm1906_vm11 = vcmask 64512   ;;  %vm2079_vm12 = vcmask 130048  }
  0x5b   : > { %2837 = vset.pattern.permute.xlu1 %v2983_v53 }
  0x5c   : > { %2712 = vrot.lane.b32.xlu0 %v2711_v5, %s2973_s15 }
  0x5e   : > { %407 = vrot.lane.b32.xlu1 %v3183_v0, %s2974_s26 }
  0x60   : > { %396 = vrot.lane.b32.xlu0 %v370_v4, %s2972_s17 }
  0x62   : > { %411 = vrot.lane.b32.xlu1 %v370_v4, %s2974_s26 }
  0x64   : > { %409 = vrot.lane.b32.xlu0 %v3185_v1, %s2974_s26 }
  0x66   : > { %405 = vrot.lane.b32.xlu1 %v3187_v2, %s2974_s26 }
  0x68   : > { %390 = vrot.lane.b32.xlu0 %v3187_v2, %s2972_s17  ;;  %s2900_s17 = sshll.u32 %s2984_s20, 4  ;;  %s2901_s17 = int_to_ptr.vmem [resolvable:$false] %s2900_s17 }
  0x69   : > { %s2902_s15 = scalar_lea.vmem %s2901_s17, 768 }
  0x6a   : > { %424 = vrot.lane.b32.xlu1 %v3185_v1, %s2975_s22 }
  0x6c   : > { %422 = vrot.lane.b32.xlu0 %v3183_v0, %s2975_s22 }
  0x6e   : > { %420 = vrot.lane.b32.xlu1 %v3187_v2, %s2975_s22 }
  0x70   : > { %426 = vrot.lane.b32.xlu0 %v370_v4, %s2975_s22 }
  0x74   : > { %2717 = vrot.lane.b32.xlu0 %v3192_v3, %s2976_s23 }
  0x78   : > { %2722 = vrot.lane.b32.xlu0 %v3192_v3, %s2977_s24 }
  0x7c   : > { %2727 = vrot.lane.b32.xlu0 %v3192_v3, %s2978_s14 }
  0xc8   : > { %v393_v6 = vpop.permute.xlu1 %392 }
  0xca   : > { %v2708_v7 = vpop.permute.xlu0 %2707 }
  0xcb   : > { %v2709_v12 = vunpack.i.l.bf16 %v2708_v7  ;;  %v2710_v38 = vunpack.i.h.bf16 %v2708_v7 }
  0xcc   : > { %v395_v8 = vpop.permute.xlu1 %394 }
  0xcd   : > { %v3230_v20 = vsel %vm398_vm1, %v393_v6, %v395_v8  ;;  %v3299_v41 = vsel %vm383_vm0, %v2709_v12, %v2710_v38 }
  0xce   : > { %v2713_v9 = vpop.permute.xlu0 %2712 }
  0xcf   : > { %v2715_v10 = vunpack.i.h.bf16 %v2713_v9  ;;  %v2714_v11 = vunpack.i.l.bf16 %v2713_v9 }
  0xd0   : > { %v408_v13 = vpop.permute.xlu1 %407 }
  0xd1   : > { %v3210_v14 = vpack.i.bf16 %v2714_v11, %v370_v4  ;;  %v3213_v15 = vsel %vm383_vm0, %v2715_v10, %v2709_v12  ;;  %v3292_v40 = vsel %vm383_vm0, %v2710_v38, %v2714_v11 }
  0xd2   : > { %v3215_v16 = vpop.permute.xlu0 %396  ;;  %v3225_v18 = vpack.i.bf16 %v3213_v15, %v3187_v2  ;;  %v2746_v42 = vpack.i.bf16 %v3292_v40, %v3299_v41 }
  0xd3   : > { %823 = vrot.lane.b32.xlu0 %v3215_v16, %s2977_s24  ;;  %2732 = vrot.lane.b32.xlu1 %v3210_v14, %s2976_s23  ;;  %v3234_v21 = vsel %vm398_vm1, %v395_v8, %v3215_v16 }
  0xd4   : > { %v3221_v17 = vpop.permute.xlu1 %411  ;;  %v2756_v27 = vpack.i.bf16 %v3234_v21, %v3230_v20 }
  0xd5   : > { %v2831_v19 = vpack.i.bf16 %v3221_v17, %v3215_v16 }
  0xd6   : > { %v410_v22 = vpop.permute.xlu0 %409 }
  0xd7   : > { %v3238_v23 = vsel %vm413_vm2, %v410_v22, %v3221_v17  ;;  %2752 = vrot.lane.b32.xlu0 %v3225_v18, %s2976_s23  ;;  %468 = vrot.lane.b32.xlu1 %v3221_v17, %s2976_s23  ;;  %v3289_v39 = vsel %vm413_vm2, %v408_v13, %v410_v22 }
  0xd8   : > { %v406_v24 = vpop.permute.xlu1 %405  ;;  %v2549_v25 = vpack.c.bf16 %v3238_v23, %v3234_v21  ;;  %v2821_v48 = vpack.i.bf16 %v3238_v23, %v3289_v39 }
  0xd9   : > { %v3247_v26 = vsel %vm413_vm2, %v406_v24, %v408_v13 }
  0xda   : > { %v391_v28 = vpop.permute.xlu0 %390 }
  0xdb   : > { %v3252_v29 = vsel %vm398_vm1, %v391_v28, %v393_v6  ;;  %2757 = vrot.lane.b32.xlu0 %v2756_v27, %s2976_s23 }
  0xdc   : > { %v2543_v30 = vpack.c.bf16 %v3247_v26, %v3252_v29  ;;  %v425_v32 = vpop.permute.xlu1 %424  ;;  %v2761_v44 = vpack.i.bf16 %v3215_v16, %v3252_v29  ;;  %v2826_v46 = vpack.i.bf16 %v3247_v26, %v3252_v29 }
  0xde   : > { %v423_v31 = vpop.permute.xlu0 %422 }
  0xdf   : > { %466 = vrot.lane.b32.xlu0 %v3238_v23, %s2976_s23  ;;  %v3266_v34 = vsel %vm428_vm3, %v423_v31, %v425_v32 }
  0xe0   : > { %v421_v35 = vpop.permute.xlu1 %420 }
  0xe1   : > { %v3273_v36 = vsel %vm428_vm3, %v421_v35, %v423_v31 }
  0xe2   : > { %v3259_v33 = vpop.permute.xlu0 %426 }
  0xe3   : > { %462 = vrot.lane.b32.xlu0 %v3247_v26, %s2976_s23  ;;  %476 = vrot.lane.b32.xlu1 %v3259_v33, %s2976_s23  ;;  %v3320_v45 = vsel %vm428_vm3, %v425_v32, %v3259_v33 }
  0xe6   : > { %v2718_v47 = vpop.permute.xlu0 %2717 }
  0xe7   : > { %472 = vrot.lane.b32.xlu0 %v3266_v34, %s2976_s23  ;;  %2737 = vrot.lane.b32.xlu1 %v3210_v14, %s2977_s24  ;;  %v2720_v13 = vunpack.i.h.bf16 %v2718_v47  ;;  %v2719_v16 = vunpack.i.l.bf16 %v2718_v47 }
  0xea   : > { %v3369_v49 = vpop.permute.xlu0 %2722 }
  0xeb   : > { %470 = vrot.lane.b32.xlu0 %v3273_v36, %s2976_s23  ;;  %831 = vrot.lane.b32.xlu1 %v3221_v17, %s2977_s24 }
  0xee   : > { %v3376_v50 = vpop.permute.xlu0 %2727 }
  0xef   : > { %2772 = vrot.lane.b32.xlu0 %v3225_v18, %s2977_s24  ;;  %839 = vrot.lane.b32.xlu1 %v3259_v33, %s2977_s24 }
  0xf3   : > { %819 = vrot.lane.b32.xlu0 %v3230_v20, %s2977_s24  ;;  %2742 = vrot.lane.b32.xlu1 %v3210_v14, %s2978_s14 }
  0xf7   : > { %827 = vrot.lane.b32.xlu0 %v3289_v39, %s2977_s24  ;;  %1343 = vrot.lane.b32.xlu1 %v3221_v17, %s2978_s14 }
  0xfb   : > { %817 = vrot.lane.b32.xlu0 %v3252_v29, %s2977_s24  ;;  %2747 = vrot.lane.b32.xlu1 %v2746_v42, %s2976_s23 }
  0xff   : > { %835 = vrot.lane.b32.xlu0 %v3266_v34, %s2977_s24  ;;  %464 = vrot.lane.b32.xlu1 %v3289_v39, %s2976_s23 }
 0x103   : > { %2777 = vrot.lane.b32.xlu0 %v3192_v3, %s2982_s19  ;;  %2762 = vrot.lane.b32.xlu1 %v2761_v44, %s2976_s23 }
 0x107   : > { %833 = vrot.lane.b32.xlu0 %v3273_v36, %s2977_s24  ;;  %474 = vrot.lane.b32.xlu1 %v3320_v45, %s2976_s23  ;;  %s2633_s23 = smul.u32 24, %s3171_s25 }
 0x10b   : > { %2792 = vrot.lane.b32.xlu0 %v3225_v18, %s2978_s14  ;;  %2767 = vrot.lane.b32.xlu1 %v2746_v42, %s2977_s24 }
 0x10f   : > { %2797 = vrot.lane.b32.xlu0 %v2756_v27, %s2978_s14  ;;  %821 = vrot.lane.b32.xlu1 %v3234_v21, %s2977_s24 }
 0x113   : > { %1341 = vrot.lane.b32.xlu0 %v3238_v23, %s2978_s14  ;;  %829 = vrot.lane.b32.xlu1 %v3238_v23, %s2977_s24 }
 0x117   : > { %1337 = vrot.lane.b32.xlu0 %v3247_v26, %s2978_s14  ;;  %825 = vrot.lane.b32.xlu1 %v3247_v26, %s2977_s24 }
 0x11b   : > { %1347 = vrot.lane.b32.xlu0 %v3266_v34, %s2978_s14  ;;  %837 = vrot.lane.b32.xlu1 %v3320_v45, %s2977_s24  ;;  %s2634_s24 = smul.u32 384, %s3056_s13  ;;  %s2240_s13 = scalar_lea.sflag [#allocation4], %s3171_s25 }
 0x11d   : > { %s3724_s27 = scalar_lea.hbm %s3777_s9, %s2634_s24 }
 0x11f   : > { %1345 = vrot.lane.b32.xlu0 %v3273_v36, %s2978_s14  ;;  %1351 = vrot.lane.b32.xlu1 %v3259_v33, %s2978_s14 }
 0x123   : > { %2812 = vrot.lane.b32.xlu0 %v3225_v18, %s2982_s19  ;;  %2782 = vrot.lane.b32.xlu1 %v3210_v14, %s2982_s19 }
 0x127   : > { %2817 = vrot.lane.b32.xlu0 %v2756_v27, %s2982_s19  ;;  %2787 = vrot.lane.b32.xlu1 %v2746_v42, %s2978_s14 }
 0x12b   : > { %2827 = vrot.lane.b32.xlu0 %v2826_v46, %s2982_s19  ;;  %1339 = vrot.lane.b32.xlu1 %v3289_v39, %s2978_s14 }
 0x12f   : > { %1716 = vrot.lane.b32.xlu0 %v3266_v34, %s2982_s19  ;;  %2802 = vrot.lane.b32.xlu1 %v2761_v44, %s2978_s14 }
 0x133   : > { %1714 = vrot.lane.b32.xlu0 %v3273_v36, %s2982_s19  ;;  %1349 = vrot.lane.b32.xlu1 %v3320_v45, %s2978_s14  ;;  %s363_s14 = scalar_lea.vmem [#allocation7], %s2633_s23 }
 0x137   : > { %2807 = vrot.lane.b32.xlu1 %v2746_v42, %s2982_s19  ;;  %2057 = vperm.xlu0 %2836, %v2054_v52  }
 0x13b   : > { %2822 = vrot.lane.b32.xlu1 %v2821_v48, %s2982_s19  ;;  %2230 = vperm.xlu0 %2836, %v2227_v56  }
 0x13f   : > { %2832 = vrot.lane.b32.xlu1 %v2831_v19, %s2982_s19 }
 0x143   : > { %1718 = vrot.lane.b32.xlu1 %v3320_v45, %s2982_s19 }
 0x145   : > { %v3380_v51 = vpop.permute.xlu0 %823  ;;  %v2733_v57 = vpop.permute.xlu1 %2732 }
 0x146   : > { %v2734_v14 = vunpack.i.l.bf16 %v2733_v57  ;;  %v2735_v18 = vunpack.i.h.bf16 %v2733_v57 }
 0x147   : > { %1720 = vrot.lane.b32.xlu1 %v3259_v33, %s2982_s19  ;;  %v480_v33 = vsel %vm478_vm5, %v2719_v16, %v2720_v13  ;;  %s2254_s19 = sshll.u32 %s363_s14, 4  ;;  %s3726_s19 = int_to_ptr.vmem [resolvable:$true] %s2254_s19 }
 0x148   : > { %v481_v35 = vsel %vm478_vm5, %v2720_v13, %v2734_v14  ;;  %s2896_s18 = scalar_lea.vmem %s3726_s19, 384  ;;  %p2903_p10 = scmp.lt.s32.totalorder %s3726_s19, %s2901_s17 }
 0x149   : > { %v2753_v55 = vpop.permute.xlu0 %2752  ;;  %v469_v60 = vpop.permute.xlu1 %468  ;;  %p2897_p4 = scmp.ne.s32.totalorder %s3726_s19, %s2896_s18  ;;  %p2904_p13 = scmp.lt.s32.totalorder %s2902_s15, %s2896_s18 }
 0x14a   : > { %v2754_v17 = vunpack.i.l.bf16 %v2753_v55  ;;  %v2755_v19 = vunpack.i.h.bf16 %v2753_v55 }
 0x14b   : > { %2069 = vperm.xlu1 %2837, %v2066_v54   ;;  %p2898_p6 = pnand %p2897_p4, %p3126_p12  ;;  %p2905_p3 = por %p2904_p13, %p2903_p10 }
 0x14c   : > { %v479_v44 = vsel %vm478_vm5, %v2754_v17, %v2719_v16 }
 0x14d   : > { %v2758_v59 = vpop.permute.xlu0 %2757  ;;  %p2899_p8 = pneg %p2898_p6 }
 0x14e   : > { %v2760_v27 = vunpack.i.h.bf16 %v2758_v59  ;;  %v2759_v28 = vunpack.i.l.bf16 %v2758_v59 }
 0x14f   : > { %1903 = vperm.xlu1 %2837, %v1900_v58   ;;  %p2906_p7 = pnand %p2905_p3, %p2899_p8 }
 0x150   : > { %v3434_v55 = vsel %vm478_vm5, %v2759_v28, %v2760_v27 }
 0x151   : > { %v467_v61 = vpop.permute.xlu0 %466 }
 0x152   : > { %v3445_v16 = vsel %vm478_vm5, %v467_v61, %v469_v60 }
 0x155   : > { %v463_v62 = vpop.permute.xlu0 %462  ;;  %v3396_v63 = vpop.permute.xlu1 %476 }
 0x159   : > { %v473_v3 = vpop.permute.xlu0 %472  ;;  %v3398_v4 = vpop.permute.xlu1 %2737 }
 0x15d   : > { %v471_v5 = vpop.permute.xlu0 %470  ;;  %v3400_v6 = vpop.permute.xlu1 %831 }
 0x161   : > { %v3402_v7 = vpop.permute.xlu0 %2772  ;;  %v3404_v8 = vpop.permute.xlu1 %839 }
 0x165   : > { %v3406_v9 = vpop.permute.xlu0 %819  ;;  %v3408_v10 = vpop.permute.xlu1 %2742 }
 0x169   : > { %v3410_v11 = vpop.permute.xlu0 %827  ;;  %v3412_v12 = vpop.permute.xlu1 %1343 }
 0x16d   : > { %v3414_v22 = vpop.permute.xlu0 %817  ;;  %v2748_v24 = vpop.permute.xlu1 %2747 }
 0x16e   : > { %v2750_v31 = vunpack.i.h.bf16 %v2748_v24  ;;  %v2749_v32 = vunpack.i.l.bf16 %v2748_v24 }
 0x170   : > { %v3419_v38 = vsel %vm478_vm5, %v2749_v32, %v2750_v31  ;;  %v3422_v42 = vsel %vm478_vm5, %v2750_v31, %v2735_v18  ;;  %v3426_v46 = vsel %vm478_vm5, %v2755_v19, %v2749_v32 }
 0x171   : > { %v3428_v47 = vpop.permute.xlu0 %835  ;;  %v465_v48 = vpop.permute.xlu1 %464  ;;  %v2523_v52 = vpack.c.bf16 %v3419_v38, %v480_v33  ;;  %v2532_v53 = vpack.c.bf16 %v3422_v42, %v481_v35  ;;  %v2525_v54 = vpack.c.bf16 %v3426_v46, %v479_v44  ;;  %v2344_v35 = vld [vmem:[%s3773_s5 + $0x8] sm:$0xff] }
 0x172   : > { %v3437_v56 = vsel %vm478_vm5, %v465_v48, %v467_v61  ;;  %v3448_v17 = vsel %vm478_vm5, %v463_v62, %v465_v48  ;;  %v491_v62 = vsel %vm478_vm5, %v471_v5, %v473_v3 }
 0x173   : > { %v2527_v57 = vpack.c.bf16 %v3437_v56, %v3434_v55  ;;  %2524 = vmatprep.subr.bf16.mxu0 %v2523_v52  ;;  %2533 = vmatpush3.bf16.msra.mxu1 %v2532_v53  ;;  %v2774_v52 = vunpack.i.l.bf16 %v3402_v7 }
 0x174   : > { %2526 = vmatpush1.bf16.msra.mxu0 %v2525_v54  ;;  %2534 = vmatprep.subr.bf16.mxu1 %v2979_v37  ;;  %v435_v54 = vld [vmem:[%s3773_s5] sm:$0xff] }
 0x175   : > { %v3442_v58 = vpop.permute.xlu0 %2777  ;;  %v2763_v59 = vpop.permute.xlu1 %2762  ;;  %2528 = vmatprep.subr.bf16.mxu0 %v2527_v57 }
 0x176   : > { %v2765_v13 = vunpack.i.h.bf16 %v2763_v59  ;;  %v2764_v14 = vunpack.i.l.bf16 %v2763_v59 }
 0x178   : > { %v3451_v18 = vsel %vm478_vm5, %v2764_v14, %v2759_v28  ;;  %v3454_v19 = vsel %vm478_vm5, %v2760_v27, %v2765_v13  ;;  %v2537_v28 = vpack.c.bf16 %v3299_v41, %v3183_v0  ;;  %v2541_v0 = vpack.c.bf16 %v3289_v39, %v3230_v20 }
 0x179   : > { %v475_v24 = vpop.permute.xlu1 %474  ;;  %v2529_v31 = vpack.c.bf16 %v3448_v17, %v3451_v18  ;;  %v2535_v32 = vpack.c.bf16 %v3445_v16, %v3454_v19  ;;  %v3460_v33 = vpop.permute.xlu0 %833  ;;  %v2739_v39 = vunpack.i.l.bf16 %v3398_v4 }
 0x17a   : > { %v492_v60 = vsel %vm478_vm5, %v473_v3, %v475_v24  ;;  %v493_v27 = vsel %vm478_vm5, %v475_v24, %v3396_v63  ;;  %v2539_v3 = vpack.c.bf16 %v3213_v15, %v3187_v2  ;;  %v2546_v63 = vpack.c.bf16 %v3292_v40, %v3185_v1 }
 0x17b   : > { %2530 = vmatpush1.bf16.msra.mxu0 %v2529_v31  ;;  %2536 = vmatpush3.bf16.msra.mxu1 %v2535_v32  ;;  %v2725_v2 = vunpack.i.h.bf16 %v3369_v49  ;;  %v2724_v15 = vunpack.i.l.bf16 %v3369_v49  ;;  %v2740_v1 = vunpack.i.h.bf16 %v3398_v4  ;;  %v2775_v40 = vunpack.i.h.bf16 %v3402_v7 }
 0x17c   : > { %521 = vmatprep.subr.mxu0 %v492_v60  ;;  %2427 = vmatprep.subr.mxu1 %v2980_v43  ;;  %v3533_v31 = vsel %vm841_vm7, %v3414_v22, %v3406_v9  ;;  %v2349_v22 = vld [vmem:[%s3773_s5 + $0x10] sm:$0xff] }
 0x17d   : > { %v2768_v61 = vpop.permute.xlu1 %2767  ;;  %v3472_v44 = vpop.permute.xlu0 %2792  ;;  %v843_v26 = vsel %vm841_vm7, %v2724_v15, %v2725_v2  ;;  %v844_v29 = vsel %vm841_vm7, %v2725_v2, %v2739_v39  ;;  %v2574_v2 = vpack.c.bf16 %v3451_v18, %v3426_v46 }
 0x17e   : > { %v2770_v41 = vunpack.i.h.bf16 %v2768_v61  ;;  %v2769_v48 = vunpack.i.l.bf16 %v2768_v61  ;;  %v854_v61 = vsel %vm841_vm7, %v3460_v33, %v3428_v47  ;;  %v2794_v46 = vunpack.i.l.bf16 %v3472_v44 }
 0x17f   : > { %522 = vmatpush1.msra.mxu0 %v491_v62  ;;  %2428 = vmatpush3.msra.mxu1 %v493_v27  ;;  %v2795_v18 = vunpack.i.h.bf16 %v3472_v44 }
 0x180   : > { %2538 = vmatprep.subr.bf16.mxu0 %v2537_v28  ;;  %2545 = vmatprep.subr.bf16.mxu1 %v2979_v37  ;;  %v846_v49 = vsel %vm841_vm7, %v2769_v48, %v2770_v41  ;;  %v845_v4 = vsel %vm841_vm7, %v2775_v40, %v2769_v48  ;;  %v847_v7 = vsel %vm841_vm7, %v2770_v41, %v2740_v1  ;;  %v2729_v41 = vunpack.i.l.bf16 %v3376_v50 }
 0x181   : > { %v822_v5 = vpop.permute.xlu1 %821  ;;  %2345 = vmatmul.mubr.msk.f32.vlgmr.msra.gmra.mrb[0].mxu0 %vm509_vm6, %v2344_v35  ;;  %2430 = vmatmul.mubr.msk.f32.vlgmr.msra.gmra.mrb[0].mxu1 %vm509_vm6, %v2344_v35  ;;  %v3493_v53 = vpop.permute.xlu0 %2797  ;;  %v2560_v59 = vpack.c.bf16 %v847_v7, %v844_v29  ;;  %v2567_v35 = vpack.c.bf16 %v3533_v31, %v845_v4  ;;  %v2572_v48 = vpack.c.bf16 %v3434_v55, %v3419_v38  ;;  %v2745_v38 = vunpack.i.h.bf16 %v3408_v10 }
 0x182   : > { %2540 = vmatpush1.bf16.msra.mxu0 %v2539_v3  ;;  %2547 = vmatpush3.bf16.msra.mxu1 %v2546_v63  ;;  %v3518_v57 = vsel %vm841_vm7, %v3406_v9, %v822_v5  ;;  %v2744_v55 = vunpack.i.l.bf16 %v3408_v10  ;;  %v2800_v39 = vunpack.i.h.bf16 %v3493_v53  ;;  %v2799_v40 = vunpack.i.l.bf16 %v3493_v53 }
 0x183   : > { %2542 = vmatprep.subr.bf16.mxu0 %v2541_v0  ;;  %2548 = vmatprep.subr.bf16.mxu1 %v2979_v37  ;;  %v2565_v27 = vpack.c.bf16 %v3518_v57, %v846_v49  ;;  %v2730_v0 = vunpack.i.h.bf16 %v3376_v50 }
 0x184   : > { %2442 = vmatprep.mubr.msk.f32.mxu1 %vm2981_vm4, %v2980_v43  ;;  %721 = vmatprep.mubr.f32.mxu0 %v2980_v43 }
 0x185   : > { %v830_v20 = vpop.permute.xlu1 %829  ;;  %v3521_v13 = vpop.permute.xlu0 %1341 }
 0x186   : > { %2544 = vmatpush1.bf16.msra.mxu0 %v2543_v30  ;;  %2550 = vmatpush3.bf16.msra.mxu1 %v2549_v25  ;;  %v852_v21 = vsel %vm841_vm7, %v3410_v11, %v830_v20  ;;  %v2551_v25 = vpack.c.bf16 %v846_v49, %v843_v26  ;;  %v842_v30 = vsel %vm841_vm7, %v2774_v52, %v2724_v15  ;;  %v798_v52 = vld [vmem:[#allocation5] sm:$0xff] }
 0x187   : > { %665 = vmatprep.subr.mxu0 %v3266_v34  ;;  %2440 = vmatprep.subr.mxu1 %v2980_v43  ;;  %v2553_v34 = vpack.c.bf16 %v845_v4, %v842_v30  ;;  %v853_v14 = vsel %vm841_vm7, %v830_v20, %v3400_v6  ;;  %v2555_v24 = vpack.c.bf16 %v852_v21, %v3518_v57 }
 0x188   : > { %v3537_v6 = vsel %vm841_vm7, %v822_v5, %v3380_v51  ;;  %v1020_v5 = vld [vmem:[#allocation5 + $0x8] sm:$0xff]  ;;  %v2577_v15 = vpack.c.bf16 %v3454_v19, %v3422_v42  ;;  %v1355_v42 = vsel %vm1353_vm9, %v2729_v41, %v2730_v0  ;;  %v3624_v29 = vsel %vm1353_vm9, %v3521_v13, %v3412_v12 }
 0x189   : > { %v826_v23 = vpop.permute.xlu1 %825  ;;  %v3549_v51 = vpop.permute.xlu0 %1337  ;;  %v2570_v3 = vpack.c.bf16 %v3537_v6, %v847_v7  ;;  %v1356_v7 = vsel %vm1353_vm9, %v2730_v0, %v2744_v55 }
 0x18a   : > { %666 = vmatpush1.msra.mxu0 %v3273_v36  ;;  %2441 = vmatpush3.msra.mxu1 %v3320_v45  ;;  %v851_v36 = vsel %vm841_vm7, %v826_v23, %v3410_v11  ;;  %v2563_v11 = vpack.c.bf16 %v853_v14, %v3537_v6 }
 0x18b   : > { %2443 = vmatmul.mubr.msk.f32.vlgmr.msra.gmra.mrb[2].mxu1 %vm509_vm6, %v435_v54  ;;  %2552 = vmatprep.subr.bf16.mxu0 %v2551_v25  ;;  %v2557_v32 = vpack.c.bf16 %v851_v36, %v3533_v31 }
 0x18c   : > { %2559 = vmatprep.subr.bf16.mxu1 %v2979_v37  ;;  %2347 = vmatmul.mubr.msk.f32.vlgmr.msra.gmra.mrb[0].mxu0 %vm509_vm6, %v435_v54  ;;  %v1354_v54 = vsel %vm1353_vm9, %v2794_v46, %v2729_v41 }
 0x18d   : > { %2554 = vmatpush1.bf16.msra.mxu0 %v2553_v34  ;;  %2561 = vmatpush3.bf16.msra.mxu1 %v2560_v59  ;;  %v838_v45 = vpop.permute.xlu1 %837 }
 0x18e   : > { %2556 = vmatprep.subr.bf16.mxu0 %v2555_v24  ;;  %2562 = vmatprep.subr.bf16.mxu1 %v2979_v37  ;;  %v855_v60 = vsel %vm841_vm7, %v3428_v47, %v838_v45  ;;  %v856_v62 = vsel %vm841_vm7, %v838_v45, %v3404_v8  ;;  %v3568_v47 = vpop.permute.xlu0 %1347  ;;  %v2356_v45 = vld [vmem:[%s3773_s5 + $0x18] sm:$0xff] }
 0x18f   : > { %2455 = vmatprep.mubr.msk.f32.mxu1 %vm2981_vm4, %v2980_v43  ;;  %939 = vmatprep.mubr.f32.mxu0 %v2980_v43 }
 0x191   : > { %2558 = vmatpush1.bf16.msra.mxu0 %v2557_v32  ;;  %2564 = vmatpush3.bf16.msra.mxu1 %v2563_v11  ;;  %v3547_v9 = vpop.permute.xlu1 %1351 }
 0x192   : > { %883 = vmatprep.subr.mxu0 %v855_v60  ;;  %2453 = vmatprep.subr.mxu1 %v2980_v43  ;;  %v1346_v50 = vpop.permute.xlu0 %1345 }
 0x193   : > { %v1366_v11 = vsel %vm1353_vm9, %v1346_v50, %v3568_v47 }
 0x195   : > { %884 = vmatpush1.msra.mxu0 %v854_v61  ;;  %2454 = vmatpush3.msra.mxu1 %v856_v62  ;;  %v3561_v28 = vpop.permute.xlu1 %2782 }
 0x196   : > { %2456 = vmatmul.mubr.msk.f32.vlgmr.msra.gmra.mrb[4].mxu1 %vm509_vm6, %v2349_v22  ;;  %2566 = vmatprep.subr.bf16.mxu0 %v2565_v27  ;;  %v3615_v26 = vpop.permute.xlu0 %2812  ;;  %v2785_v41 = vunpack.i.h.bf16 %v3561_v28 }
 0x197   : > { %2569 = vmatprep.subr.bf16.mxu1 %v2979_v37  ;;  %2350 = vmatmul.mubr.msk.f32.vlgmr.msra.gmra.mrb[0].mxu0 %vm509_vm6, %v2349_v22 }
 0x198   : > { %2568 = vmatpush1.bf16.msra.mxu0 %v2567_v35  ;;  %2571 = vmatpush3.bf16.msra.mxu1 %v2570_v3  ;;  %v2780_v35 = vunpack.i.h.bf16 %v3442_v58  ;;  %v2779_v3 = vunpack.i.l.bf16 %v3442_v58  ;;  %v2815_v58 = vunpack.i.h.bf16 %v3615_v26 }
 0x199   : > { %1029 = vmatprep.subr.mxu0 %v852_v21  ;;  %2462 = vmatprep.subr.mxu1 %v2980_v43  ;;  %v2788_v8 = vpop.permute.xlu1 %2787 }
 0x19a   : > { %v2790_v33 = vunpack.i.h.bf16 %v2788_v8  ;;  %v2789_v63 = vunpack.i.l.bf16 %v2788_v8  ;;  %1089 = vmatprep.mubr.f32.mxu0 %v2980_v43  ;;  %2464 = vmatprep.mubr.msk.f32.mxu1 %vm2981_vm4, %v2980_v43  ;;  %v2814_v8 = vunpack.i.l.bf16 %v3615_v26 }
 0x19c   : > { %1030 = vmatpush1.msra.mxu0 %v851_v36  ;;  %2463 = vmatpush3.msra.mxu1 %v853_v14  ;;  %v3584_v20 = vsel %vm1353_vm9, %v2789_v63, %v2790_v33  ;;  %v3599_v10 = vsel %vm1353_vm9, %v2790_v33, %v2745_v38  ;;  %v3643_v36 = vpop.permute.xlu0 %2817  ;;  %v1724_v38 = vsel %vm1722_vm10, %v2779_v3, %v2780_v35 }
 0x19d   : > { %2352 = vmatmul.mubr.msk.f32.vlgmr.msra.gmra.mrb[2].mxu0 %vm1021_vm8, %v1020_v5  ;;  %2573 = vmatprep.subr.bf16.mxu0 %v2572_v48  ;;  %v1340_v1 = vpop.permute.xlu1 %1339  ;;  %v2579_v19 = vpack.c.bf16 %v3584_v20, %v1355_v42  ;;  %v2588_v21 = vpack.c.bf16 %v3599_v10, %v1356_v7  ;;  %v2820_v33 = vunpack.i.h.bf16 %v3643_v36  ;;  %v1723_v55 = vsel %vm1722_vm10, %v2814_v8, %v2779_v3 }
 0x19e   : > { %2576 = vmatprep.subr.bf16.mxu1 %v2979_v37  ;;  %2465 = vmatmul.mubr.msk.f32.vlgmr.msra.gmra.mrb[6].mxu1 %vm1021_vm8, %v1020_v5  ;;  %v3611_v53 = vsel %vm1353_vm9, %v1340_v1, %v3521_v13  ;;  %v3631_v34 = vsel %vm1353_vm9, %v3549_v51, %v1340_v1 }
 0x19f   : > { %2575 = vmatpush1.bf16.msra.mxu0 %v2574_v2  ;;  %2578 = vmatpush3.bf16.msra.mxu1 %v2577_v15 }
 0x1a0   : > { %1173 = vmatprep.subr.mxu0 %v3437_v56  ;;  %2471 = vmatprep.subr.mxu1 %v2980_v43  ;;  %v3605_v56 = vsel %vm1353_vm9, %v2795_v18, %v2789_v63  ;;  %v2819_v63 = vunpack.i.l.bf16 %v3643_v36  ;;  %v2828_v5 = vpop.permute.xlu0 %2827 }
 0x1a1   : > { %2473 = vmatprep.mubr.msk.f32.mxu1 %vm2981_vm4, %v2980_v43  ;;  %v2803_v49 = vpop.permute.xlu1 %2802  ;;  %1233 = vmatprep.mubr.f32.mxu0 %v2980_v43 }
 0x1a2   : > { %v2805_v44 = vunpack.i.h.bf16 %v2803_v49  ;;  %v2804_v4 = vunpack.i.l.bf16 %v2803_v49  ;;  %v1730_v18 = vsel %vm1722_vm10, %v2819_v63, %v2820_v33 }
 0x1a3   : > { %1174 = vmatpush1.msra.mxu0 %v3448_v17  ;;  %2472 = vmatpush3.msra.mxu1 %v3445_v16  ;;  %v2581_v17 = vpack.c.bf16 %v3605_v56, %v1354_v54  ;;  %v1361_v16 = vsel %vm1353_vm9, %v2799_v40, %v2800_v39 }
 0x1a4   : > { %2474 = vmatmul.mubr.msk.f32.vlgmr.msra.gmra.mrb[8].mxu1 %vm1021_vm8, %v798_v52  ;;  %2580 = vmatprep.subr.bf16.mxu0 %v2579_v19  ;;  %v1362_v23 = vsel %vm1353_vm9, %v2800_v39, %v2805_v44  ;;  %v1360_v25 = vsel %vm1353_vm9, %v2804_v4, %v2799_v40  ;;  %v2583_v59 = vpack.c.bf16 %v3611_v53, %v1361_v16  ;;  %v2830_v19 = vunpack.i.h.bf16 %v2828_v5  ;;  %v1717_v49 = vpop.permute.xlu0 %1716 }
 0x1a5   : > { %2587 = vmatprep.subr.bf16.mxu1 %v2979_v37  ;;  %v1350_v30 = vpop.permute.xlu1 %1349  ;;  %v2591_v14 = vpack.c.bf16 %v3624_v29, %v1362_v23  ;;  %2354 = vmatmul.mubr.msk.f32.vlgmr.msra.gmra.mrb[2].mxu0 %vm1021_vm8, %v798_v52  ;;  %v2585_v12 = vpack.c.bf16 %v3631_v34, %v1360_v25  ;;  %v2593_v60 = vpack.c.bf16 %v1361_v16, %v3584_v20  ;;  %v2829_v39 = vunpack.i.l.bf16 %v2828_v5  ;;  %v2361_v16 = vld [vmem:[%s3773_s5 + $0x20] sm:$0xff] }
 0x1a6   : > { %2589 = vmatpush3.bf16.msra.mxu1 %v2588_v21  ;;  %2582 = vmatpush1.bf16.msra.mxu0 %v2581_v17  ;;  %v1367_v13 = vsel %vm1353_vm9, %v3568_v47, %v1350_v30  ;;  %v1368_v32 = vsel %vm1353_vm9, %v1350_v30, %v3547_v9  ;;  %v2598_v47 = vpack.c.bf16 %v1362_v23, %v3599_v10  ;;  %v2784_v9 = vunpack.i.l.bf16 %v3561_v28  ;;  %v1532_v28 = vld [vmem:[#allocation5 + $0x10] sm:$0xff] }
 0x1a7   : > { %2590 = vmatprep.subr.bf16.mxu1 %v2979_v37  ;;  %2584 = vmatprep.subr.bf16.mxu0 %v2583_v59  ;;  %v2595_v0 = vpack.c.bf16 %v1360_v25, %v3605_v56 }
 0x1a8   : > { %2486 = vmatprep.mubr.msk.f32.mxu1 %vm2981_vm4, %v2980_v43  ;;  %1451 = vmatprep.mubr.f32.mxu0 %v2980_v43  ;;  %v1725_v46 = vsel %vm1722_vm10, %v2780_v35, %v2784_v9 }
 0x1a9   : > { %v2808_v24 = vpop.permute.xlu1 %2807 }
 0x1aa   : > { %2592 = vmatpush3.bf16.msra.mxu1 %v2591_v14  ;;  %2586 = vmatpush1.bf16.msra.mxu0 %v2585_v12  ;;  %v2810_v22 = vunpack.i.h.bf16 %v2808_v24  ;;  %v2809_v61 = vunpack.i.l.bf16 %v2808_v24 }
 0x1ab   : > { %2484 = vmatprep.subr.mxu1 %v2980_v43  ;;  %1395 = vmatprep.subr.mxu0 %v1367_v13 }
 0x1ac   : > { %v1727_v1 = vsel %vm1722_vm10, %v2809_v61, %v2810_v22  ;;  %v1726_v50 = vsel %vm1722_vm10, %v2815_v58, %v2809_v61  ;;  %v1728_v42 = vsel %vm1722_vm10, %v2810_v22, %v2785_v41 }
 0x1ad   : > { %v2823_v51 = vpop.permute.xlu1 %2822  ;;  %v2600_v40 = vpack.c.bf16 %v1727_v1, %v1724_v38  ;;  %v2602_v56 = vpack.c.bf16 %v1726_v50, %v1723_v55  ;;  %v2609_v7 = vpack.c.bf16 %v1728_v42, %v1725_v46 }
 0x1ae   : > { %2485 = vmatpush3.msra.mxu1 %v1368_v32  ;;  %v2825_v62 = vunpack.i.h.bf16 %v2823_v51  ;;  %v2824_v27 = vunpack.i.l.bf16 %v2823_v51  ;;  %1396 = vmatpush1.msra.mxu0 %v1366_v11 }
 0x1af   : > { %2487 = vmatmul.mubr.msk.f32.vlgmr.msra.gmra.mrb[10].mxu1 %vm509_vm6, %v2356_v45  ;;  %2594 = vmatprep.subr.bf16.mxu0 %v2593_v60 }
 0x1b0   : > { %2597 = vmatprep.subr.bf16.mxu1 %v2979_v37  ;;  %2357 = vmatmul.mubr.msk.f32.vlgmr.msra.gmra.mrb[0].mxu0 %vm509_vm6, %v2356_v45  ;;  %v1733_v20 = vsel %vm1722_vm10, %v2824_v27, %v2825_v62  ;;  %v1732_v54 = vsel %vm1722_vm10, %v2830_v19, %v2824_v27 }
 0x1b1   : > { %2599 = vmatpush3.bf16.msra.mxu1 %v2598_v47  ;;  %v2833_v48 = vpop.permute.xlu1 %2832  ;;  %2596 = vmatpush1.bf16.msra.mxu0 %v2595_v0  ;;  %v2604_v10 = vpack.c.bf16 %v1733_v20, %v1730_v18 }
 0x1b2   : > { %2493 = vmatprep.subr.mxu1 %v2980_v43  ;;  %v2835_v2 = vunpack.i.h.bf16 %v2833_v48  ;;  %v2834_v15 = vunpack.i.l.bf16 %v2833_v48  ;;  %1540 = vmatprep.subr.mxu0 %v3611_v53  ;;  %v1729_v53 = vsel %vm1722_vm10, %v2829_v39, %v2819_v63 }
 0x1b3   : > { %1600 = vmatprep.mubr.f32.mxu0 %v2980_v43  ;;  %2495 = vmatprep.mubr.msk.f32.mxu1 %vm2981_vm4, %v2980_v43  ;;  %v2606_v21 = vpack.c.bf16 %v1732_v54, %v1729_v53 }
 0x1b4   : > { %v1731_v44 = vsel %vm1722_vm10, %v2820_v33, %v2834_v15  ;;  %v1734_v4 = vsel %vm1722_vm10, %v2825_v62, %v2835_v2 }
 0x1b5   : > { %2494 = vmatpush3.msra.mxu1 %v3624_v29  ;;  %v1719_v52 = vpop.permute.xlu1 %1718  ;;  %1541 = vmatpush1.msra.mxu0 %v3631_v34  ;;  %v2612_v26 = vpack.c.bf16 %v1734_v4, %v1731_v44  ;;  %v1715_v29 = vpop.permute.xlu0 %1714  ;;  %v1310_v34 = vld [vmem:[%s3769_s1] sm:$0xff] }
 0x1b6   : > { %2496 = vmatmul.mubr.msk.f32.vlgmr.msra.gmra.mrb[12].mxu1 %vm1021_vm8, %v1532_v28  ;;  %2359 = vmatmul.mubr.msk.f32.vlgmr.msra.gmra.mrb[2].mxu0 %vm1021_vm8, %v1532_v28  ;;  %v1736_v23 = vsel %vm1722_vm10, %v1717_v49, %v1719_v52  ;;  %v1735_v30 = vsel %vm1722_vm10, %v1715_v29, %v1717_v49 }
 0x1b7   : > { %2601 = vmatprep.subr.bf16.mxu0 %v2600_v40  ;;  %2608 = vmatprep.subr.bf16.mxu1 %v2979_v37 }
 0x1b8   : > { %2603 = vmatpush1.bf16.msra.mxu0 %v2602_v56  ;;  %2610 = vmatpush3.bf16.msra.mxu1 %v2609_v7 }
 0x1b9   : > { %2605 = vmatprep.subr.bf16.mxu0 %v2604_v10  ;;  %2611 = vmatprep.subr.bf16.mxu1 %v2979_v37  ;;  %v1721_v25 = vpop.permute.xlu1 %1720  ;;  %v2058_v3 = vpop.permute.xlu0 %2057 }
 0x1ba   : > { %1820 = vmatprep.mubr.f32.mxu0 %v2980_v43  ;;  %2508 = vmatprep.mubr.msk.f32.mxu1 %vm2981_vm4, %v2980_v43  ;;  %v1737_v17 = vsel %vm1722_vm10, %v1719_v52, %v1721_v25  ;;  %v2078_v52 = vld [vmem:[%s3775_s7] sm:$0xff] }
 0x1bc   : > { %2607 = vmatpush1.bf16.msra.mxu0 %v2606_v21  ;;  %2613 = vmatpush3.bf16.msra.mxu1 %v2612_v26 }
 0x1bd   : > { %1764 = vmatprep.subr.mxu0 %v1736_v23  ;;  %2506 = vmatprep.subr.mxu1 %v2980_v43  ;;  %v2231_v29 = vpop.permute.xlu0 %2230 }
 0x1c0   : > { %1765 = vmatpush1.msra.mxu0 %v1735_v30  ;;  %2507 = vmatpush3.msra.mxu1 %v1737_v17 }
 0x1c1   : > { %2362 = vmatmul.mubr.msk.f32.vlgmr.msra.gmra.mrb[0].mxu0 %vm509_vm6, %v2361_v16  ;;  %2509 = vmatmul.mubr.msk.f32.vlgmr.msra.gmra.mrb[14].mxu1 %vm509_vm6, %v2361_v16 }
 0x1c2   : > { %1910 = vmatprep.subr.mxu0 %v3518_v57  ;;  %2511 = vmatprep.subr.mxu1 %v2980_v43 }
 0x1c3   : > { %1911 = vmatpush1.msra.mxu0 %v3533_v31  ;;  %2512 = vmatpush3.msra.mxu1 %v3537_v6 }
 0x1c4   : > { %1974 = vmatprep.mubr.f32.mxu0 %v2980_v43  ;;  %2513 = vmatprep.mubr.msk.f32.mxu1 %vm2981_vm4, %v2980_v43 }
 0x1c5   : > { %2364 = vmatmul.mubr.msk.f32.vlgmr.msra.gmra.mrb[4].mxu0 %vm1906_vm11, %v1310_v34  ;;  %2514 = vmatmul.mubr.msk.f32.vlgmr.msra.gmra.mrb[16].mxu1 %vm1906_vm11, %v1310_v34 }
 0x1c6   : > { %2618 = vmatprep.subr.bf16.mxu1 %v2979_v37  ;;  %2147 = vmatprep.mubr.f32.mxu0 %v2980_v43 }
 0x1c7   : > { %2520 = vmatprep.mubr.msk.f32.mxu1 %vm2981_vm4, %v2980_v43 }
 0x1ca   : > { %v2070_v9 = vpop.permute.xlu1 %2069 }
 0x1ce   : > { %v1904_v49 = vpop.permute.xlu1 %1903 }
 0x254   : > { %v650_v57 = vpop.f32.mrb[0].mxu1 }
 0x255   : > { %v2431_v59 = vpop.f32.mrb[1].mxu1 }
 0x25e   : > { %v794_v14 = vpop.f32.mrb[2].mxu1 }
 0x25f   : > { %v795_v31 = vadd.f32 %v794_v14, %v650_v57  ;;  %v2444_v12 = vpop.f32.mrb[3].mxu1 }
 0x269   : > { %v1012_v6 = vpop.f32.mrb[4].mxu1 }
 0x26a   : > { %v1018_v13 = vadd.f32 %v1012_v6, %v795_v31  ;;  %v2457_v24 = vpop.f32.mrb[5].mxu1 }
 0x271   : > { %v1162_v36 = vpop.f32.mrb[6].mxu1 }
 0x272   : > { %v2466_v45 = vpop.f32.mrb[7].mxu1 }
 0x277   : > { %v1306_v11 = vpop.f32.mrb[8].mxu1 }
 0x278   : > { %v1307_v32 = vadd.f32 %v1306_v11, %v1162_v36  ;;  %v2475_v60 = vpop.f32.mrb[9].mxu1 }
 0x282   : > { %v1524_v51 = vpop.f32.mrb[10].mxu1 }
 0x283   : > { %v1530_v37 = vadd.f32 %v1524_v51, %v1018_v13  ;;  %v2488_v22 = vpop.f32.mrb[11].mxu1 }
 0x289   : > { %v1673_v61 = vpop.f32.mrb[12].mxu1  ;;  %v1602_v62 = vpop.f32.mrb[2].mxu0 }
 0x28a   : > { %v1679_v27 = vadd.f32 %v1673_v61, %v1307_v32  ;;  %v2497_v43 = vpop.f32.mrb[13].mxu1  ;;  %v1604_v35 = vpop.f32.mrb[3].mxu0  ;;  %v2060_v8 = vadd.f32 %v2058_v3, %v1602_v62 }
 0x28b   : > { %v2061_v47 = vadd.f32 %v2058_v3, %v1604_v35 }
 0x28c   : > { %v2062_v58 = vadd.f32 %v2058_v3, %v1679_v27  ;;  %v2063_v15 = vmax.f32 %v2060_v8, 0.0 }
 0x28d   : > { %v2064_v20 = vmax.f32 %v2061_v47, 0.0 }
 0x28e   : > { %v2065_v18 = vmax.f32 %v2062_v58, 0.0 }
 0x294   : > { %v1822_v33 = vpop.f32.mrb[0].mxu0  ;;  %v1893_v5 = vpop.f32.mrb[14].mxu1 }
 0x295   : > { %v2072_v63 = vadd.f32 %v2070_v9, %v1822_v33  ;;  %v1824_v0 = vpop.f32.mrb[1].mxu0  ;;  %v1899_v41 = vadd.f32 %v1893_v5, %v1530_v37  ;;  %v2510_v2 = vpop.f32.mrb[15].mxu1 }
 0x296   : > { %v2073_v48 = vadd.f32 %v2070_v9, %v1824_v0 }
 0x297   : > { %v2075_v1 = vmax.f32 %v2072_v63, 0.0  ;;  %v2074_v50 = vadd.f32 %v2070_v9, %v1899_v41 }
 0x298   : > { %v2076_v28 = vmax.f32 %v2073_v48, 0.0  ;;  %v1976_v38 = vpop.f32.mrb[4].mxu0  ;;  %v2047_v46 = vpop.f32.mrb[16].mxu1 }
 0x299   : > { %v2616_v55 = vpack.c.bf16 %v2075_v1, %v2063_v15  ;;  %v1978_v42 = vpop.f32.mrb[5].mxu0  ;;  %v2077_v19 = vmax.f32 %v2074_v50, 0.0  ;;  %v2515_v40 = vpop.f32.mrb[17].mxu1  ;;  %v1977_v56 = vadd.f32 %v1976_v38, %v1904_v49  ;;  %v2048_v44 = vadd.f32 %v2047_v46, %v1904_v49 }
 0x29a   : > { %v2614_v39 = vpack.c.bf16 %v2076_v28, %v2064_v20  ;;  %v1979_v4 = vadd.f32 %v1978_v42, %v1904_v49 }
 0x29b   : > { %v2619_v10 = vpack.c.bf16 %v2077_v19, %v2065_v18  ;;  %v2051_v7 = vmax.f32 %v1977_v56, 0.0  ;;  %v2053_v54 = vmax.f32 %v2048_v44, 0.0 }
 0x29c   : > { %2615 = vmatprep.subr.bf16.mxu0 %v2614_v39  ;;  %v2052_v53 = vmax.f32 %v1979_v4, 0.0 }
 0x29d   : > { %2617 = vmatpush1.bf16.msra.mxu0 %v2616_v55  ;;  %2620 = vmatpush3.bf16.msra.mxu1 %v2619_v10 }
 0x2a0   : > { %2366 = vmatmul.mubr.msk.f32.vlgmr.msra.gmra.mrb[6].mxu0 %vm2079_vm12, %v2078_v52  ;;  %2521 = vmatmul.mubr.msk.f32.vlgmr.msra.gmra.mrb[18].mxu1 %vm2079_vm12, %v2078_v52 }
 0x373   : > { %v2149_v26 = vpop.f32.mrb[6].mxu0  ;;  %v2220_v23 = vpop.f32.mrb[18].mxu1 }
 0x374   : > { %v2224_v21 = vadd.f32 %v2149_v26, %v2051_v7  ;;  %v2151_v25 = vpop.f32.mrb[7].mxu0  ;;  %v2226_v17 = vadd.f32 %v2220_v23, %v2053_v54  ;;  %v2522_v30 = vpop.f32.mrb[19].mxu1 }
 0x375   : > { %v2225_v16 = vadd.f32 %v2151_v25, %v2052_v53 }
 0x376   : > { %v2233_v34 = vadd.f32 %v2231_v29, %v2224_v21  ;;  %v2235_v57 = vadd.f32 %v2231_v29, %v2226_v17 }
 0x377   : > { %v2234_v59 = vadd.f32 %v2231_v29, %v2225_v16 }
 0x378   : > { %2236 = vst [vmem:[%s363_s14] sm:$0xff] %v2233_v34  ;;  %2238 = vst [vmem:[%s363_s14 + $0x10] sm:$0xff] %v2235_v57 }
 0x379   : > { %2237 = vst [vmem:[%s363_s14 + $0x8] sm:$0xff] %v2234_v59 }
 0x37a   : > { %2909 = shalt.err (!%p2906_p7)
}
 0x37b   : > { %s2910_s25 = scalar_lea.hbm %s3724_s27, 384  ;;  %s2914_s23 = scalar_lea.hbm %s3777_s9, 768 }
 0x37c   : > { %p2911_p9 = scmp.ne.s32.totalorder %s3724_s27, %s2910_s25  ;;  %p2915_p0 = scmp.lt.u32.totalorder %s3724_s27, %s3777_s9 }
 0x37d   : > { %p2916_p1 = scmp.lt.u32.totalorder %s2914_s23, %s2910_s25  ;;  %p2918_p4 = scmp.lt.u32.totalorder %s2910_s25, %s3724_s27 }
 0x37e   : > { %p2912_p2 = pnand %p2911_p9, %p3126_p12 }
 0x37f   : > { %p2917_p11 = por %p2916_p1, %p2915_p0 }
 0x380   : > { %p2913_p5 = pneg %p2912_p2 }
 0x381   : > { %p2919_p6 = por %p2918_p4, %p2917_p11 }
 0x383   : > { %p2920_p8 = pnand %p2919_p6, %p2913_p5 }
 0x385   : > { %2923 = shalt.err (!%p2920_p8)
}
 0x386   : > { %2641 = dma.vmem_to_hbm [thread:$0]  (%p3126_p12), %s3726_s19, 384, %s3724_s27, %s2240_s13  }
 0x387 PF: > { %s3797_s16 = sld [smem:[#allocation11_spill]]  ;;  %s2266_s21 = sand.u32 1, %s2954_s30  }
 0x388   : > { %p3799_p13 = scmp.ge.s32.totalorder %s2966_s12, 2  ;;  %s2267_s18 = scalar_lea.sflag [#allocation4], %s2266_s21 }
 0x38d   : > { %p3798_p10 = scmp.ne.s32.totalorder %s3797_s16, 0 }
 0x38f   : > { %p2652_p3 = pnand %p3799_p13, %p3798_p10 }
 0x391   : > { %2949 = dma.done.wait (!%p2652_p3), %s2267_s18, 384  }
 0x392   : > { %2951 = vsyncadd (!%p2652_p3), %s2267_s18, 4294966912  ;;  %s3800_s12 = sld [smem:[#allocation12_spill]]  ;;  %s3801_s30 = smov %s2958_s10 }
 0x393   : > { %s3802_s10 = smov %s2962_s11  ;;  %s3803_s11 = smov %s3122_s28 }
 0x398   : > { %p23_p7 = scmp.ge.s32.totalorder %s3800_s12, 4  }
 0x39a   :  { %25 = sbr.rel (!%p23_p7) target bundleno = 6 (0x6), region = 111 }
 0x3a1   :  { %2272 = vsyncpa [#allocation3], 1 }
 0x3a2   :  { %2274 = vsyncpa [#allocation3 + $0x1], 1 }
 0x3a3   :  { %2275 = vsyncpa [#allocation6], 1 }
 0x3a4   :  { %2276 = vsyncpa [#allocation4], 1 }
 0x3a5   :  { %2278 = vsyncpa [#allocation4 + $0x1], 1 }

</bundles_post_ra>
